<compile_context>
chip_gen: v7x
topology: tpu7x:2x2x1
jax: 0.10.0
libtpu: 0.0.40
codegen_flags: <defaults>
</compile_context>

<pallas_src>
import functools

import jax
import jax.numpy as jnp
from jax.experimental import pallas as pl
from jax.experimental.pallas import tpu as pltpu

_VMEM = pltpu.MemorySpace.VMEM


# ----------------------------- fused Pallas kernel ----------------------------------
def _upconv_block_kernel(*refs, BB, H, W, Cx, Cs, Cout, act, has_skip):
    """One batch chunk: pad+concat in VMEM scratch, single fused (M,9*Ct)@(9*Ct,4*Cout)
    matmul, +shift (bias/BN folded), activation, lane-dense single store."""
    if has_skip:
        x_ref, s_ref, w_ref, shift_ref, o_ref, xpad, ostage = refs
    else:
        x_ref, w_ref, shift_ref, o_ref, xpad, ostage = refs
        s_ref = None
    Ct = Cx + Cs
    M = BB * H * W

    # Zero the padded scratch once; the interior [1:H+1,1:W+1,0:Ct] is fully
    # overwritten every grid step (grid is sequential, see dimension_semantics).
    @pl.when(pl.program_id(0) == 0)
    def _():
        xpad[...] = jnp.zeros(xpad.shape, jnp.float32)

    xpad[:, 1:H + 1, 1:W + 1, 0:Cx] = x_ref[...]
    if has_skip:
        xpad[:, 1:H + 1, 1:W + 1, Cx:Ct] = s_ref[...]

    # 9 unique shifted views of the padded input, lane-concatenated -> (M, 9*Ct)
    cols = []
    for sy in range(3):
        for sx in range(3):
            v = xpad[:, sy:sy + H, sx:sx + W, :]     # (BB, H, W, Ct)
            cols.append(v.reshape(M, Ct))            # collapse leading dims
    xcol = jnp.concatenate(cols, axis=-1)            # (M, 9*Ct)

    # ONE matmul against the zero-padded fused phase weight (scale pre-folded).
    acc = jnp.dot(xcol, w_ref[...],
                  preferred_element_type=jnp.float32,
                  precision=jax.lax.Precision.HIGHEST)   # (M, 4*Cout)
    y = acc + shift_ref[...]                              # bias / folded BN shift
    if act == "relu":
        y = jnp.maximum(y, 0.0)
    elif act == "leakyrelu":
        y = jnp.where(y >= 0.0, y, 0.01 * y)
    elif act == "tanh":
        y = jnp.tanh(y)

    # Repack (M, 4*Cout) -> (BB*H, W*4*Cout) so the store is lane-dense (>=128 lanes
    # at the test shape). Rows of `y` are ordered (b, i, j); rows j, j+W, j+2W, ...
    # form lane-block j of the wide row, gathered with a strided ref read.
    ostage[...] = y
    wide = jnp.concatenate(
        [ostage[pl.ds(j, BB * H, stride=W), :] for j in range(W)], axis=-1)
    o_ref[...] = wide.astype(o_ref.dtype)


def upconv_transpose2d(x_nchw, skip_nchw, w_fused, shift4, act, *, target_rows=512):
    """Fused ConvTranspose2d(k=4, s=2, p=1) [+ channel-concat skip] + shift + act.

    x_nchw:    (B, Cx, H, W)
    skip_nchw: (B, Cs, H, W) or None
    w_fused:   (9*(Cx+Cs), 4*Cout) zero-padded fused phase weights (scale folded in)
    shift4:    (1, 4*Cout) folded bias / eval-mode BatchNorm shift
    returns:   (B, Cout, 2H, 2W)
    """
    B, Cx, H, W = x_nchw.shape
    Cs = 0 if skip_nchw is None else skip_nchw.shape[1]
    Ct = Cx + Cs
    Cout = w_fused.shape[1] // 4
    assert w_fused.shape[0] == 9 * Ct

    # Batch chunk so the matmul M dimension is >= ~target_rows (amortize per-step
    # overhead); chunk must divide B.
    BB = max(1, min(B, -(-target_rows // (H * W))))
    while B % BB:
        BB -= 1
    num_chunks = B // BB

    # TODO(synk): keep NHWC/phase layout between chained blocks to drop these HBM ops.
    x_nhwc = jnp.transpose(x_nchw, (0, 2, 3, 1)).astype(jnp.float32)
    ins = [x_nhwc]
    in_specs = [pl.BlockSpec((BB, H, W, Cx), lambda c: (c, 0, 0, 0))]
    if skip_nchw is not None:
        ins.append(jnp.transpose(skip_nchw, (0, 2, 3, 1)).astype(jnp.float32))
        in_specs.append(pl.BlockSpec((BB, H, W, Cs), lambda c: (c, 0, 0, 0)))
    ins += [w_fused, shift4]
    in_specs += [pl.BlockSpec(memory_space=_VMEM)] * 2   # whole-array resident weights

    kernel = functools.partial(_upconv_block_kernel, BB=BB, H=H, W=W, Cx=Cx, Cs=Cs,
                               Cout=Cout, act=act, has_skip=skip_nchw is not None)
    out = pl.pallas_call(
        kernel,
        out_shape=jax.ShapeDtypeStruct((B * H, W * 4 * Cout), jnp.float32),
        grid=(num_chunks,),
        in_specs=in_specs,
        out_specs=pl.BlockSpec((BB * H, W * 4 * Cout), lambda c: (c, 0)),
        scratch_shapes=[pltpu.VMEM((BB, H + 2, W + 2, Ct), jnp.float32),
                        pltpu.VMEM((BB * H * W, 4 * Cout), jnp.float32)],
        compiler_params=pltpu.CompilerParams(
            # sequential grid: the zero-once xpad init relies on scratch persisting
            # across steps; measured parallel-vs-arbitrary impact is near-zero anyway.
            dimension_semantics=("arbitrary",)),
    )(*ins)

    # Untangle the 2x2 phase interleave back to NCHW (wrapper glue).
    out = out.reshape(B, H, W, 2, 2, Cout)
    out = jnp.transpose(out, (0, 5, 1, 3, 2, 4))          # (B, Cout, H, 2, W, 2)
    return out.reshape(B, Cout, 2 * H, 2 * W)


# ----------------------------- parameter preparation --------------------------------
def fold_upconv_params(weight_t, bias, bn=None, eps=1e-5):
    """weight_t: torch-layout ConvTranspose2d weight (Cin_total, Cout, 4, 4).

    Emits the zero-padded fused phase weight (9*Cin_total, 4*Cout): row block
    s = 3*sy + sx (padded-input shift), column block p = 2*a + b (output phase).
    The per-channel scale (bias=identity / eval-mode BatchNorm) is folded into the
    weight columns; only the additive shift (tiled per phase) stays for the kernel."""
    Cin_t, Cout = weight_t.shape[0], weight_t.shape[1]
    if bn is None:
        scale = jnp.ones((Cout,), jnp.float32)
        shift = bias.astype(jnp.float32)
    else:
        gamma, beta, mean, var = bn
        s = gamma / jnp.sqrt(var + eps)
        scale = s.astype(jnp.float32)
        shift = (beta + s * (bias - mean)).astype(jnp.float32)

    w = weight_t.astype(jnp.float32)
    zero_blk = jnp.zeros((Cin_t, Cout), jnp.float32)
    row_blocks = []
    for sy in range(3):
        for sx in range(3):
            phase_blocks = []
            for a in range(2):
                for b in range(2):
                    dy, dx = sy - a, sx - b
                    if 0 <= dy <= 1 and 0 <= dx <= 1:
                        # kernel tap for output phase (a,b), padded-input offset (dy,dx)
                        blk = w[:, :, 3 - a - 2 * dy, 3 - b - 2 * dx] * scale[None, :]
                    else:
                        blk = zero_blk
                    phase_blocks.append(blk)
            row_blocks.append(jnp.concatenate(phase_blocks, axis=1))  # (Cin_t, 4*Cout)
    w_fused = jnp.concatenate(row_blocks, axis=0)                     # (9*Cin_t, 4*Cout)
    shift4 = jnp.tile(shift.reshape(1, Cout), (1, 4))                 # (1, 4*Cout)
    return w_fused, shift4


# ----------------------------- module-equivalent forward ----------------------------
def upconv_blocks_forward(params, x, *, skip_connection=False, first_block=False,
                          last_block=False, non_lin="relu"):
    """UpConv_Blocks.forward. If skip_connection, `x` is (tensor, skip_con_list); the
    last skip tensor is popped and channel-concatenated (unless first_block), and the
    result is returned as [y, skip_con_list] (unless last_block), matching torch."""
    skip_list, skip = None, None
    if skip_connection:
        x, skip_list = x
        if not first_block:
            skip = skip_list.pop(-1)
    act = None if last_block else non_lin
    y = upconv_transpose2d(x, skip, params["w_fused"], params["shift4"], act)
    if skip_connection and not last_block:
        return [y, skip_list]
    return y


# ----------------------------- pure-JAX reference (correctness check) ---------------
def _ref_conv_transpose(x, weight_t, bias):
    wf = jnp.flip(weight_t, axis=(2, 3))                    # flip spatial taps
    wf = jnp.transpose(wf, (1, 0, 2, 3))                    # (Cout, Cin, 4, 4) OIHW
    y = jax.lax.conv_general_dilated(
        x, wf, window_strides=(1, 1), padding=[(2, 2), (2, 2)],
        lhs_dilation=(2, 2), dimension_numbers=("NCHW", "OIHW", "NCHW"),
        precision=jax.lax.Precision.HIGHEST)
    return y + bias.reshape(1, -1, 1, 1)


def _ref_block(x, skip, weight_t, bias, act, bn=None, eps=1e-5):
    xin = x if skip is None else jnp.concatenate([x, skip], axis=1)
    y = _ref_conv_transpose(xin, weight_t, bias)
    if bn is not None:
        gamma, beta, mean, var = bn
        rs = lambda t: t.reshape(1, -1, 1, 1)
        y = (y - rs(mean)) / jnp.sqrt(rs(var) + eps) * rs(gamma) + rs(beta)
    if act == "relu":
        y = jnp.maximum(y, 0.0)
    elif act == "leakyrelu":
        y = jnp.where(y >= 0.0, y, 0.01 * y)
    elif act == "tanh":
        y = jnp.tanh(y)
    return y


# ----------------------------- main --------------------------------------------------
if __name__ == "__main__":
    key = jax.random.PRNGKey(0)
    k = jax.random.split(key, 12)
    B, H, W = 2, 8, 8

    # ---- config 1: default block (no skip, no BN, non_lin='relu') ------------------
    Cin1, Cout1 = 8, 4
    w1 = jax.random.normal(k[0], (Cin1, Cout1, 4, 4), jnp.float32) * 0.1
    b1 = jax.random.normal(k[1], (Cout1,), jnp.float32) * 0.1
    wf1, sh1 = fold_upconv_params(w1, b1)
    params1 = {"w_fused": wf1, "shift4": sh1}
    x1 = jax.random.normal(k[2], (B, Cin1, H, W), jnp.float32)

    y1 = upconv_blocks_forward(params1, x1)
    jax.block_until_ready(y1)
    assert y1.shape == (B, Cout1, 2 * H, 2 * W)
    ref1 = _ref_block(x1, None, w1, b1, "relu")
    assert float(jnp.max(jnp.abs(y1 - ref1))) < 5e-3, "config-1 mismatch"

    # ---- config 2: skip-connection middle block with eval-mode BatchNorm -----------
    Cin2, Cout2 = 4, 4
    w2 = jax.random.normal(k[3], (2 * Cin2, Cout2, 4, 4), jnp.float32) * 0.1
    b2 = jax.random.normal(k[4], (Cout2,), jnp.float32) * 0.1
    gamma2 = 1.0 + 0.2 * jax.random.normal(k[7], (Cout2,), jnp.float32)
    beta2 = 0.1 * jax.random.normal(k[8], (Cout2,), jnp.float32)
    mean2 = 0.1 * jax.random.normal(k[9], (Cout2,), jnp.float32)
    var2 = jax.random.uniform(k[10], (Cout2,), jnp.float32, 0.5, 1.5)
    bn2 = (gamma2, beta2, mean2, var2)
    wf2, sh2 = fold_upconv_params(w2, b2, bn=bn2)
    params2 = {"w_fused": wf2, "shift4": sh2}
    x2 = jax.random.normal(k[5], (B, Cin2, H, W), jnp.float32)
    skip2 = jax.random.normal(k[6], (B, Cin2, H, W), jnp.float32)

    y2, remaining = upconv_blocks_forward(
        params2, (x2, [skip2]), skip_connection=True, first_block=False,
        last_block=False, non_lin="relu")
    jax.block_until_ready(y2)
    assert y2.shape == (B, Cout2, 2 * H, 2 * W)
    assert remaining == []
    ref2 = _ref_block(x2, skip2, w2, b2, "relu", bn=bn2)
    assert float(jnp.max(jnp.abs(y2 - ref2))) < 5e-3, "config-2 mismatch"

    print("KERNEL_OK")
</pallas_src>

<mosaic_0001>
module attributes {stable_mosaic.version = 11 : i64} {
  func.func @_upconv_block_kernel(%arg0: i32, %arg1: memref<2x8x8x8xf32, #tpu.memory_space<vmem>>, %arg2: memref<72x16xf32, #tpu.memory_space<vmem>>, %arg3: memref<1x16xf32, #tpu.memory_space<vmem>>, %arg4: memref<16x128xf32, #tpu.memory_space<vmem>>, %arg5: memref<2x10x10x8xf32, #tpu.memory_space<vmem>>, %arg6: memref<128x16xf32, #tpu.memory_space<vmem>>) attributes {dimension_semantics = [#tpu.dimension_semantics<arbitrary>], iteration_bounds = array<i64: 1>, scalar_prefetch = 0 : i64, scratch_operands = 2 : i64, tpu.core_type = #tpu.core_type<tc>, window_params = [{transform_indices = @transform_0, window_bounds = array<i64: 2, 8, 8, 8>}, {pipeline_mode = #tpu.pipeline_mode<synchronous>, transform_indices = @transform_1, window_bounds = array<i64: 72, 16>}, {pipeline_mode = #tpu.pipeline_mode<synchronous>, transform_indices = @transform_2, window_bounds = array<i64: 1, 16>}, {transform_indices = @transform_3, window_bounds = array<i64: 16, 128>}]} {
    %c0_i32 = arith.constant 0 : i32
    %0 = arith.cmpi eq, %arg0, %c0_i32 : i32
    %1 = arith.extui %0 : i1 to i32
    %c0_i32_0 = arith.constant 0 : i32
    %2 = arith.cmpi ne, %1, %c0_i32_0 : i32
    scf.if %2 {
      %cst_62 = arith.constant 0.000000e+00 : f32
      %42 = vector.broadcast %cst_62 : f32 to vector<2x10x10x8xf32>
      %c0_63 = arith.constant 0 : index
      %c0_64 = arith.constant 0 : index
      %c0_65 = arith.constant 0 : index
      %c0_66 = arith.constant 0 : index
      %43 = vector.load %arg5[%c0_63, %c0_64, %c0_65, %c0_66] : memref<2x10x10x8xf32, #tpu.memory_space<vmem>>, vector<2x10x10x8xf32>
      tpu.vector_store %arg5[%c0_63, %c0_64, %c0_65, %c0_66], %42 {strides = array<i32>} : memref<2x10x10x8xf32, #tpu.memory_space<vmem>>, vector<2x10x10x8xf32>,
    } else {
    }
    %c0 = arith.constant 0 : index
    %c0_1 = arith.constant 0 : index
    %c0_2 = arith.constant 0 : index
    %c0_3 = arith.constant 0 : index
    %3 = vector.load %arg1[%c0, %c0_1, %c0_2, %c0_3] : memref<2x8x8x8xf32, #tpu.memory_space<vmem>>, vector<2x8x8x8xf32>
    %c0_4 = arith.constant 0 : index
    %c1 = arith.constant 1 : index
    %c1_5 = arith.constant 1 : index
    %c0_6 = arith.constant 0 : index
    %4 = vector.load %arg5[%c0_4, %c1, %c1_5, %c0_6] : memref<2x10x10x8xf32, #tpu.memory_space<vmem>>, vector<2x8x8x8xf32>
    tpu.vector_store %arg5[%c0_4, %c1, %c1_5, %c0_6], %3 {strides = array<i32>} : memref<2x10x10x8xf32, #tpu.memory_space<vmem>>, vector<2x8x8x8xf32>,
    %c0_7 = arith.constant 0 : index
    %c0_8 = arith.constant 0 : index
    %c0_9 = arith.constant 0 : index
    %c0_10 = arith.constant 0 : index
    %5 = vector.load %arg5[%c0_7, %c0_8, %c0_9, %c0_10] : memref<2x10x10x8xf32, #tpu.memory_space<vmem>>, vector<2x8x8x8xf32>
    %6 = vector.shape_cast %5 : vector<2x8x8x8xf32> to vector<128x8xf32>
    %c0_11 = arith.constant 0 : index
    %c0_12 = arith.constant 0 : index
    %c1_13 = arith.constant 1 : index
    %c0_14 = arith.constant 0 : index
    %7 = vector.load %arg5[%c0_11, %c0_12, %c1_13, %c0_14] : memref<2x10x10x8xf32, #tpu.memory_space<vmem>>, vector<2x8x8x8xf32>
    %8 = vector.shape_cast %7 : vector<2x8x8x8xf32> to vector<128x8xf32>
    %c0_15 = arith.constant 0 : index
    %c0_16 = arith.constant 0 : index
    %c2 = arith.constant 2 : index
    %c0_17 = arith.constant 0 : index
    %9 = vector.load %arg5[%c0_15, %c0_16, %c2, %c0_17] : memref<2x10x10x8xf32, #tpu.memory_space<vmem>>, vector<2x8x8x8xf32>
    %10 = vector.shape_cast %9 : vector<2x8x8x8xf32> to vector<128x8xf32>
    %c0_18 = arith.constant 0 : index
    %c1_19 = arith.constant 1 : index
    %c0_20 = arith.constant 0 : index
    %c0_21 = arith.constant 0 : index
    %11 = vector.load %arg5[%c0_18, %c1_19, %c0_20, %c0_21] : memref<2x10x10x8xf32, #tpu.memory_space<vmem>>, vector<2x8x8x8xf32>
    %12 = vector.shape_cast %11 : vector<2x8x8x8xf32> to vector<128x8xf32>
    %c0_22 = arith.constant 0 : index
    %c1_23 = arith.constant 1 : index
    %c1_24 = arith.constant 1 : index
    %c0_25 = arith.constant 0 : index
    %13 = vector.load %arg5[%c0_22, %c1_23, %c1_24, %c0_25] : memref<2x10x10x8xf32, #tpu.memory_space<vmem>>, vector<2x8x8x8xf32>
    %14 = vector.shape_cast %13 : vector<2x8x8x8xf32> to vector<128x8xf32>
    %c0_26 = arith.constant 0 : index
    %c1_27 = arith.constant 1 : index
    %c2_28 = arith.constant 2 : index
    %c0_29 = arith.constant 0 : index
    %15 = vector.load %arg5[%c0_26, %c1_27, %c2_28, %c0_29] : memref<2x10x10x8xf32, #tpu.memory_space<vmem>>, vector<2x8x8x8xf32>
    %16 = vector.shape_cast %15 : vector<2x8x8x8xf32> to vector<128x8xf32>
    %c0_30 = arith.constant 0 : index
    %c2_31 = arith.constant 2 : index
    %c0_32 = arith.constant 0 : index
    %c0_33 = arith.constant 0 : index
    %17 = vector.load %arg5[%c0_30, %c2_31, %c0_32, %c0_33] : memref<2x10x10x8xf32, #tpu.memory_space<vmem>>, vector<2x8x8x8xf32>
    %18 = vector.shape_cast %17 : vector<2x8x8x8xf32> to vector<128x8xf32>
    %c0_34 = arith.constant 0 : index
    %c2_35 = arith.constant 2 : index
    %c1_36 = arith.constant 1 : index
    %c0_37 = arith.constant 0 : index
    %19 = vector.load %arg5[%c0_34, %c2_35, %c1_36, %c0_37] : memref<2x10x10x8xf32, #tpu.memory_space<vmem>>, vector<2x8x8x8xf32>
    %20 = vector.shape_cast %19 : vector<2x8x8x8xf32> to vector<128x8xf32>
    %c0_38 = arith.constant 0 : index
    %c2_39 = arith.constant 2 : index
    %c2_40 = arith.constant 2 : index
    %c0_41 = arith.constant 0 : index
    %21 = vector.load %arg5[%c0_38, %c2_39, %c2_40, %c0_41] : memref<2x10x10x8xf32, #tpu.memory_space<vmem>>, vector<2x8x8x8xf32>
    %22 = vector.shape_cast %21 : vector<2x8x8x8xf32> to vector<128x8xf32>
    %23 = tpu.concatenate %6, %8, %10, %12, %14, %16, %18, %20, %22 in 1 : vector<128x8xf32>, vector<128x8xf32>, vector<128x8xf32>, vector<128x8xf32>, vector<128x8xf32>, vector<128x8xf32>, vector<128x8xf32>, vector<128x8xf32>, vector<128x8xf32> -> vector<128x72xf32>
    %c0_42 = arith.constant 0 : index
    %c0_43 = arith.constant 0 : index
    %24 = vector.load %arg2[%c0_42, %c0_43] : memref<72x16xf32, #tpu.memory_space<vmem>>, vector<72x16xf32>
    %cst = arith.constant dense<0.000000e+00> : vector<128x16xf32>
    %25 = tpu.matmul %23, %24, %cst {dimension_numbers = #tpu.dot_dimension_numbers<[1], [0], [0], [1], [0, 0, 1, 1], [], []>, precision = #tpu.contract_precision<fp32>} : vector<128x72xf32>, vector<72x16xf32>, vector<128x16xf32> -> vector<128x16xf32>
    %c0_44 = arith.constant 0 : index
    %c0_45 = arith.constant 0 : index
    %26 = vector.load %arg3[%c0_44, %c0_45] : memref<1x16xf32, #tpu.memory_space<vmem>>, vector<1x16xf32>
    %27 = vector.broadcast %26 : vector<1x16xf32> to vector<128x16xf32>
    %28 = arith.addf %25, %27 : vector<128x16xf32>
    %cst_46 = arith.constant 0.000000e+00 : f32
    %29 = vector.broadcast %cst_46 : f32 to vector<128x16xf32>
    %30 = arith.maximumf %28, %29 : vector<128x16xf32>
    %c0_47 = arith.constant 0 : index
    %c0_48 = arith.constant 0 : index
    %31 = vector.load %arg6[%c0_47, %c0_48] : memref<128x16xf32, #tpu.memory_space<vmem>>, vector<128x16xf32>
    tpu.vector_store %arg6[%c0_47, %c0_48], %30 {strides = array<i32>} : memref<128x16xf32, #tpu.memory_space<vmem>>, vector<128x16xf32>,
    %c0_49 = arith.constant 0 : index
    %c0_50 = arith.constant 0 : index
    %32 = tpu.strided_load %arg6[%c0_49, %c0_50] {strides = array<i32: 8, 1>} : memref<128x16xf32, #tpu.memory_space<vmem>>, vector<16x16xf32>
    %c1_51 = arith.constant 1 : index
    %c0_52 = arith.constant 0 : index
    %33 = tpu.strided_load %arg6[%c1_51, %c0_52] {strides = array<i32: 8, 1>} : memref<128x16xf32, #tpu.memory_space<vmem>>, vector<16x16xf32>
    %c2_53 = arith.constant 2 : index
    %c0_54 = arith.constant 0 : index
    %34 = tpu.strided_load %arg6[%c2_53, %c0_54] {strides = array<i32: 8, 1>} : memref<128x16xf32, #tpu.memory_space<vmem>>, vector<16x16xf32>
    %c3 = arith.constant 3 : index
    %c0_55 = arith.constant 0 : index
    %35 = tpu.strided_load %arg6[%c3, %c0_55] {strides = array<i32: 8, 1>} : memref<128x16xf32, #tpu.memory_space<vmem>>, vector<16x16xf32>
    %c4 = arith.constant 4 : index
    %c0_56 = arith.constant 0 : index
    %36 = tpu.strided_load %arg6[%c4, %c0_56] {strides = array<i32: 8, 1>} : memref<128x16xf32, #tpu.memory_space<vmem>>, vector<16x16xf32>
    %c5 = arith.constant 5 : index
    %c0_57 = arith.constant 0 : index
    %37 = tpu.strided_load %arg6[%c5, %c0_57] {strides = array<i32: 8, 1>} : memref<128x16xf32, #tpu.memory_space<vmem>>, vector<16x16xf32>
    %c6 = arith.constant 6 : index
    %c0_58 = arith.constant 0 : index
    %38 = tpu.strided_load %arg6[%c6, %c0_58] {strides = array<i32: 8, 1>} : memref<128x16xf32, #tpu.memory_space<vmem>>, vector<16x16xf32>
    %c7 = arith.constant 7 : index
    %c0_59 = arith.constant 0 : index
    %39 = tpu.strided_load %arg6[%c7, %c0_59] {strides = array<i32: 8, 1>} : memref<128x16xf32, #tpu.memory_space<vmem>>, vector<16x16xf32>
    %40 = tpu.concatenate %32, %33, %34, %35, %36, %37, %38, %39 in 1 : vector<16x16xf32>, vector<16x16xf32>, vector<16x16xf32>, vector<16x16xf32>, vector<16x16xf32>, vector<16x16xf32>, vector<16x16xf32>, vector<16x16xf32> -> vector<16x128xf32>
    %c0_60 = arith.constant 0 : index
    %c0_61 = arith.constant 0 : index
    %41 = vector.load %arg4[%c0_60, %c0_61] : memref<16x128xf32, #tpu.memory_space<vmem>>, vector<16x128xf32>
    tpu.vector_store %arg4[%c0_60, %c0_61], %40 {strides = array<i32>} : memref<16x128xf32, #tpu.memory_space<vmem>>, vector<16x128xf32>,
    return
  }
  func.func @transform_0(%arg0: i32) -> (i32, i32, i32, i32) {
    %c0_i32 = arith.constant 0 : i32
    %c0_i32_0 = arith.constant 0 : i32
    %c0_i32_1 = arith.constant 0 : i32
    %c0_i32_2 = arith.constant 0 : i32
    return %arg0, %c0_i32, %c0_i32_0, %c0_i32_1 : i32, i32, i32, i32
  }
  func.func @transform_1(%arg0: i32) -> (i32, i32) {
    %c0_i32 = arith.constant 0 : i32
    %c0_i32_0 = arith.constant 0 : i32
    %c0_i32_1 = arith.constant 0 : i32
    return %c0_i32, %c0_i32_0 : i32, i32
  }
  func.func @transform_2(%arg0: i32) -> (i32, i32) {
    %c0_i32 = arith.constant 0 : i32
    %c0_i32_0 = arith.constant 0 : i32
    %c0_i32_1 = arith.constant 0 : i32
    return %c0_i32, %c0_i32_0 : i32, i32
  }
  func.func @transform_3(%arg0: i32) -> (i32, i32) {
    %c0_i32 = arith.constant 0 : i32
    %c0_i32_0 = arith.constant 0 : i32
    return %arg0, %c0_i32 : i32, i32
  }
}

</mosaic_0001>

<bundles_post_ra>
// kernel: tpu_custom_call.1
= control target key start
LH: loop header
LB: loop body
LE: loop exit
PB: predicated region body
PF: predicated region fallthrough
CT: control target
= control target key end

     0   :  { %8 = vsyncpa [#allocation5], 0  ;;  %s4062_s0 = inlined_call_operand.hbm [shape: f32[2,8,8,8], index: 0, kind: input, shape index: {}]   ;;  %s4063_s1 = inlined_call_operand.vmem [shape: f32[72,16], index: 1, kind: input, shape index: {}]   ;;  %s4064_s2 = inlined_call_operand.vmem [shape: f32[1,16], index: 2, kind: input, shape index: {}]   ;;  %s4065_s3 = inlined_call_operand.hbm [shape: f32[16,128], index: 3, kind: output, shape index: {}]  }
   0x1   :  { %9 = vsyncpa [#allocation6], 0  ;;  %s3006_s12 = smov [#allocation4]   ;;  %s2958_s16 = scalar_lea.hbm %s4062_s0, 2048 }
   0x2   :  { %s15_s13 = sshll.u32 %s3006_s12, 4  ;;  %p2959_p0 = scmp.ne.s32.totalorder %s4062_s0, %s2958_s16  ;;  %s16_s13 = int_to_ptr.vmem [resolvable:$true] %s15_s13 }
   0x3   :  { %p2962_p1 = scmp.lt.u32.totalorder %s2958_s16, %s4062_s0 }
   0x5   :  { %p2964_p2 = pnand %p2962_p1, %p2959_p0 }
   0x7   :  { %2967 = shalt.err (!%p2964_p2)
}
   0x8   :  { %s2968_s21 = scalar_lea.vmem %s16_s13, 2048  ;;  %p2973_p4 = scmp.lt.s32.totalorder %s16_s13, %s16_s13 }
   0x9   :  { %p2969_p3 = scmp.ne.s32.totalorder %s16_s13, %s2968_s21  ;;  %p2974_p5 = scmp.lt.s32.totalorder %s2968_s21, %s2968_s21 }
   0xb   :  { %p2975_p6 = por %p2974_p5, %p2973_p4 }
   0xd   :  { %p2976_p7 = pnand %p2975_p6, %p2969_p3 }
   0xf   :  { %2979 = shalt.err (!%p2976_p7)
}
  0x10   :  { %s3007_s22 = smov 128   ;;  %s3008_s23 = smov 8  }
  0x11   :  { %21 = dma.hbm_to_vmem [thread:$0]  %s4062_s0, 2048, %s16_s13, [#allocation5], %s3007_s22, %s3007_s22, %s3008_s23  }
  0x12   :  { %3002 = dma.done.wait [#allocation5], 2048  }
  0x13   :  { %3003 = vsyncadd [#allocation5], 4294965248  ;;  %vm33_vm0 = vcmask 64512   ;;  %vm35_vm1 = vcmask 58368   ;;  %v3009_v0 = vmov 0.0   ;;  %v75_v1 = vld [vmem:[#allocation4] sm:$0xff] }
  0x14   :  { %34 = vst.msk [vmem:[#allocation2] sm:$0xff] %vm33_vm0, %v3009_v0  ;;  %37 = vst.msk [vmem:[#allocation2 + $0x10] sm:$0xff] %vm33_vm0, %v3009_v0  ;;  %v76_v2 = vld [vmem:[#allocation4 + $0x8] sm:$0xff]  ;;  %v77_v3 = vld [vmem:[#allocation4 + $0x10] sm:$0xff]  ;;  %s3010_s0 = smov 16   ;;  %s3011_s26 = smov 24  }
  0x15   :  { %36 = vst.msk [vmem:[#allocation2 + $0x8] sm:$0x3] %vm35_vm1, %v3009_v0  ;;  %38 = vst.msk [vmem:[#allocation2 + $0x18] sm:$0x3] %vm35_vm1, %v3009_v0  ;;  %v78_v6 = vld [vmem:[#allocation4 + $0x18] sm:$0xff]  ;;  %v79_v7 = vld [vmem:[#allocation4 + $0x20] sm:$0xff] }
  0x16   :  { %39 = vst.msk [vmem:[#allocation2 + $0x20] sm:$0xff] %vm33_vm0, %v3009_v0  ;;  %41 = vst.msk [vmem:[#allocation2 + $0x30] sm:$0xff] %vm33_vm0, %v3009_v0  ;;  %v80_v8 = vld [vmem:[#allocation4 + $0x28] sm:$0xff]  ;;  %v81_v9 = vld [vmem:[#allocation4 + $0x30] sm:$0xff]  ;;  %s3012_s27 = smov 32   ;;  %s3013_s28 = smov 40  }
  0x17   :  { %40 = vst.msk [vmem:[#allocation2 + $0x28] sm:$0x3] %vm35_vm1, %v3009_v0  ;;  %42 = vst.msk [vmem:[#allocation2 + $0x38] sm:$0x3] %vm35_vm1, %v3009_v0  ;;  %v82_v10 = vld [vmem:[#allocation4 + $0x38] sm:$0xff]  ;;  %v83_v11 = vld [vmem:[#allocation4 + $0x40] sm:$0xff] }
  0x18   :  { %43 = vst.msk [vmem:[#allocation2 + $0x40] sm:$0xff] %vm33_vm0, %v3009_v0  ;;  %45 = vst.msk [vmem:[#allocation2 + $0x50] sm:$0xff] %vm33_vm0, %v3009_v0  ;;  %v84_v12 = vld [vmem:[#allocation4 + $0x48] sm:$0xff]  ;;  %v85_v18 = vld [vmem:[#allocation4 + $0x50] sm:$0xff]  ;;  %s3014_s6 = smov 48   ;;  %s3015_s15 = smov 56  }
  0x19   :  { %44 = vst.msk [vmem:[#allocation2 + $0x48] sm:$0x3] %vm35_vm1, %v3009_v0  ;;  %46 = vst.msk [vmem:[#allocation2 + $0x58] sm:$0x3] %vm35_vm1, %v3009_v0  ;;  %v3128_v21 = vld [vmem:[%s4063_s1] sm:$0xff]  ;;  %v3133_v22 = vld [vmem:[%s4063_s1 + $0x8] sm:$0xff] }
  0x1a   :  { %47 = vst.msk [vmem:[#allocation2 + $0x60] sm:$0xff] %vm33_vm0, %v3009_v0  ;;  %49 = vst.msk [vmem:[#allocation2 + $0x70] sm:$0xff] %vm33_vm0, %v3009_v0  ;;  %v967_v23 = vand.u32 4294901760, %v3128_v21  ;;  %v970_v24 = vand.u32 4294901760, %v3133_v22  ;;  %v3149_v26 = vld [vmem:[%s4063_s1 + $0x10] sm:$0xff]  ;;  %v3154_v27 = vld [vmem:[%s4063_s1 + $0x18] sm:$0xff] }
  0x1b   :  { %48 = vst.msk [vmem:[#allocation2 + $0x68] sm:$0x3] %vm35_vm1, %v3009_v0  ;;  %50 = vst.msk [vmem:[#allocation2 + $0x78] sm:$0x3] %vm35_vm1, %v3009_v0  ;;  %v973_v30 = vand.u32 4294901760, %v3149_v26  ;;  %v976_v31 = vand.u32 4294901760, %v3154_v27 }
  0x1c   :  { %51 = vst.msk [vmem:[#allocation2 + $0x80] sm:$0xff] %vm33_vm0, %v3009_v0  ;;  %53 = vst.msk [vmem:[#allocation2 + $0x90] sm:$0xff] %vm33_vm0, %v3009_v0  ;;  %v141_v4 = vld [vmem:[#allocation2 + $0x2] sm:$0xff]  ;;  %v3141_v25 = vpack.c.bf16 %v970_v24, %v967_v23  ;;  %v86_v33 = vld [vmem:[#allocation4 + $0x58] sm:$0xff]  ;;  %s3016_s24 = smov 64   ;;  %vm782_vm2 = vcmask 130048  }
  0x1d   :  { %52 = vst.msk [vmem:[#allocation2 + $0x88] sm:$0x3] %vm35_vm1, %v3009_v0  ;;  %54 = vst.msk [vmem:[#allocation2 + $0x98] sm:$0x3] %vm35_vm1, %v3009_v0  ;;  %v125_v5 = vld [vmem:[#allocation2 + $0x1] sm:$0xff]  ;;  %334 = vrot.lane.b32.xlu1 %v141_v4, %s3010_s0  ;;  %v3168_v32 = vpack.c.bf16 %v976_v31, %v973_v30  ;;  %v3202_v39 = vld [vmem:[%s4063_s1 + $0x30] sm:$0xff] }
  0x1e   :  { %55 = vst.msk [vmem:[#allocation2 + $0xa0] sm:$0xff] %vm33_vm0, %v3009_v0  ;;  %57 = vst.msk [vmem:[#allocation2 + $0xb0] sm:$0xff] %vm33_vm0, %v3009_v0  ;;  %270 = vrot.lane.b32.xlu0 %v125_v5, %s3008_s23  ;;  %2800 = vmatprep.subr.bf16.mxu0 %v3141_v25  ;;  %v3176_v34 = vld [vmem:[%s4063_s1 + $0x20] sm:$0xff]  ;;  %v3181_v35 = vld [vmem:[%s4063_s1 + $0x28] sm:$0xff]  ;;  %v4067_v42 = vand.u32 4294901760, %v3202_v39  ;;  %vm799_vm3 = vcmask 195584  }
  0x1f   :  { %56 = vst.msk [vmem:[#allocation2 + $0xa8] sm:$0x3] %vm35_vm1, %v3009_v0  ;;  %58 = vst.msk [vmem:[#allocation2 + $0xb8] sm:$0x3] %vm35_vm1, %v3009_v0  ;;  %2752 = vmatprep.subr.bf16.mxu1 %v3141_v25  ;;  %2802 = vmatpush3.bf16.msra.mxu0 %v3141_v25  ;;  %v4069_v36 = vand.u32 4294901760, %v3176_v34  ;;  %v4068_v37 = vand.u32 4294901760, %v3181_v35 }
  0x20   :  { %59 = vst.msk [vmem:[#allocation2 + $0xc0] sm:$0xff] %vm33_vm0, %v3009_v0  ;;  %61 = vst.msk [vmem:[#allocation2 + $0xd0] sm:$0xff] %vm33_vm0, %v3009_v0  ;;  %2754 = vmatpush3.bf16.msra.mxu1 %v3141_v25  ;;  %2804 = vmatprep.subr.bf16.mxu0 %v3168_v32  ;;  %v3207_v40 = vld [vmem:[%s4063_s1 + $0x38] sm:$0xff]  ;;  %v3232_v45 = vld [vmem:[%s4063_s1 + $0x40] sm:$0xff]  ;;  %vm816_vm4 = vcmask 261120   ;;  %vm833_vm5 = vcmask 326656  }
  0x21   :  { %60 = vst.msk [vmem:[#allocation2 + $0xc8] sm:$0x3] %vm35_vm1, %v3009_v0  ;;  %62 = vst.msk [vmem:[#allocation2 + $0xd8] sm:$0x3] %vm35_vm1, %v3009_v0  ;;  %2756 = vmatprep.subr.bf16.mxu1 %v3168_v32  ;;  %v3194_v38 = vpack.c.bf16 %v4068_v37, %v4069_v36  ;;  %v4066_v43 = vand.u32 4294901760, %v3207_v40  ;;  %v3236_v46 = vand.u32 4294901760, %v3232_v45 }
  0x22   :  { %63 = vst.msk [vmem:[#allocation2 + $0xe0] sm:$0xff] %vm33_vm0, %v3009_v0  ;;  %65 = vst.msk [vmem:[#allocation2 + $0xf0] sm:$0xff] %vm33_vm0, %v3009_v0  ;;  %v87_v48 = vld [vmem:[#allocation4 + $0x60] sm:$0xff]  ;;  %v88_v53 = vld [vmem:[#allocation4 + $0x68] sm:$0xff]  ;;  %vm850_vm6 = vcmask 392192   ;;  %vm867_vm7 = vcmask 457728  }
  0x23   :  { %64 = vst.msk [vmem:[#allocation2 + $0xe8] sm:$0x3] %vm35_vm1, %v3009_v0  ;;  %66 = vst.msk [vmem:[#allocation2 + $0xf8] sm:$0x3] %vm35_vm1, %v3009_v0  ;;  %2806 = vmatpush3.bf16.msra.mxu0 %v3168_v32  ;;  %v3221_v44 = vpack.c.bf16 %v4066_v43, %v4067_v42  ;;  %v89_v56 = vld [vmem:[#allocation4 + $0x70] sm:$0xff]  ;;  %v90_v61 = vld [vmem:[#allocation4 + $0x78] sm:$0xff] }
  0x24   :  { %67 = vst.msk [vmem:[#allocation2 + $0x100] sm:$0xff] %vm33_vm0, %v3009_v0  ;;  %69 = vst.msk [vmem:[#allocation2 + $0x110] sm:$0xff] %vm33_vm0, %v3009_v0  ;;  %2758 = vmatpush3.bf16.msra.mxu1 %v3168_v32  ;;  %2808 = vmatprep.subr.bf16.mxu0 %v3194_v38  ;;  %vm884_vm8 = vcmask 523264   ;;  %vm917_vm9 = vcmask 588800   ;;  %vm2320_vm10 = vcmask 654336   ;;  %vm2323_vm11 = vcmask 785408  }
  0x25   :  { %68 = vst.msk [vmem:[#allocation2 + $0x108] sm:$0x3] %vm35_vm1, %v3009_v0  ;;  %70 = vst.msk [vmem:[#allocation2 + $0x118] sm:$0x3] %vm35_vm1, %v3009_v0  ;;  %2760 = vmatprep.subr.bf16.mxu1 %v3194_v38  ;;  %vm2326_vm12 = vcmask 916480  }
  0x26   :  { %71 = vst.msk [vmem:[#allocation2 + $0x120] sm:$0xff] %vm33_vm0, %v3009_v0  ;;  %73 = vst.msk [vmem:[#allocation2 + $0x130] sm:$0xff] %vm33_vm0, %v3009_v0 }
  0x27   :  { %72 = vst.msk [vmem:[#allocation2 + $0x128] sm:$0x3] %vm35_vm1, %v3009_v0  ;;  %74 = vst.msk [vmem:[#allocation2 + $0x138] sm:$0x3] %vm35_vm1, %v3009_v0  ;;  %2810 = vmatpush3.bf16.msra.mxu0 %v3194_v38  ;;  %v133_v0 = vld [vmem:[#allocation2 + $0xa1] sm:$0xff] }
  0x28   :  { %93 = vst.msk [vmem:[#allocation2 + $0x11] sm:$0xff] %vm33_vm0, %v75_v1  ;;  %94 = vst.msk [vmem:[#allocation2 + $0x21] sm:$0xff] %vm33_vm0, %v76_v2  ;;  %2762 = vmatpush3.bf16.msra.mxu1 %v3194_v38  ;;  %2812 = vmatprep.subr.bf16.mxu0 %v3221_v44 }
  0x29   :  { %95 = vst.msk [vmem:[#allocation2 + $0x31] sm:$0xff] %vm33_vm0, %v77_v3  ;;  %96 = vst.msk [vmem:[#allocation2 + $0x41] sm:$0xff] %vm33_vm0, %v78_v6  ;;  %2764 = vmatprep.subr.bf16.mxu1 %v3221_v44  ;;  %v149_v3 = vld [vmem:[#allocation2 + $0xa2] sm:$0xff] }
  0x2a   :  { %97 = vst.msk [vmem:[#allocation2 + $0x51] sm:$0xff] %vm33_vm0, %v79_v7  ;;  %98 = vst.msk [vmem:[#allocation2 + $0x61] sm:$0xff] %vm33_vm0, %v80_v8 }
  0x2b   :  { %99 = vst.msk [vmem:[#allocation2 + $0x71] sm:$0xff] %vm33_vm0, %v81_v9  ;;  %100 = vst.msk [vmem:[#allocation2 + $0x81] sm:$0xff] %vm33_vm0, %v82_v10  ;;  %2814 = vmatpush3.bf16.msra.mxu0 %v3221_v44 }
  0x2c   :  { %101 = vst.msk [vmem:[#allocation2 + $0xb1] sm:$0xff] %vm33_vm0, %v83_v11  ;;  %102 = vst.msk [vmem:[#allocation2 + $0xc1] sm:$0xff] %vm33_vm0, %v84_v12  ;;  %2766 = vmatpush3.bf16.msra.mxu1 %v3221_v44  ;;  %2641 = vmatprep.subr.mxu0 %v3236_v46  ;;  %v213_v12 = vld [vmem:[#allocation2 + $0x90] sm:$0xff] }
  0x2d   :  { %103 = vst.msk [vmem:[#allocation2 + $0xd1] sm:$0xff] %vm33_vm0, %v85_v18  ;;  %104 = vst.msk [vmem:[#allocation2 + $0xe1] sm:$0xff] %vm33_vm0, %v86_v33  ;;  %2515 = vmatprep.subr.mxu1 %v3236_v46 }
  0x2e   :  { %4080 = vst [vmem:[#allocation10_spill] sm:$0xff] %v3194_v38  ;;  %4081 = vst [vmem:[#allocation11_spill] sm:$0xff] %v3221_v44  ;;  %v237_v44 = vld [vmem:[#allocation2 + $0x131] sm:$0xff] }
  0x2f   :  { %v142_v13 = vld [vmem:[#allocation2 + $0x12] sm:$0xff]  ;;  %v3110_v15 = vld [vmem:[#allocation2 + $0x20] sm:$0xff]  ;;  %2642 = vmatpush3.msra.mxu0 %v3236_v46  ;;  %105 = vst.msk [vmem:[#allocation2 + $0xf1] sm:$0xff] %vm33_vm0, %v87_v48  ;;  %106 = vst.msk [vmem:[#allocation2 + $0x101] sm:$0xff] %vm33_vm0, %v88_v53 }
  0x30   :  { %v126_v14 = vld [vmem:[#allocation2 + $0x11] sm:$0xff]  ;;  %336 = vrot.lane.b32.xlu1 %v142_v13, %s3010_s0  ;;  %v127_v17 = vld [vmem:[#allocation2 + $0x21] sm:$0xff]  ;;  %2516 = vmatpush3.msra.mxu1 %v3236_v46  ;;  %107 = vst.msk [vmem:[#allocation2 + $0x111] sm:$0xff] %vm33_vm0, %v89_v56  ;;  %108 = vst.msk [vmem:[#allocation2 + $0x121] sm:$0xff] %vm33_vm0, %v90_v61 }
  0x31   :  { %272 = vrot.lane.b32.xlu0 %v126_v14, %s3008_s23  ;;  %v3112_v16 = vld [vmem:[#allocation2 + $0x10] sm:$0xff]  ;;  %v143_v19 = vld [vmem:[#allocation2 + $0x22] sm:$0xff] }
  0x32   :  { %v128_v20 = vld [vmem:[#allocation2 + $0x31] sm:$0xff]  ;;  %v3209_v41 = vld [vmem:[#allocation2 + $0x40] sm:$0xff] }
  0x33   :  { %v3156_v28 = vld [vmem:[#allocation2 + $0x30] sm:$0xff]  ;;  %v176_v47 = vld [vmem:[#allocation2 + $0x41] sm:$0xff] }
  0x34   :  { %400 = vrot.lane.b32.xlu1 %v3110_v15, %s3011_s26  ;;  %v144_v29 = vld [vmem:[#allocation2 + $0x32] sm:$0xff]  ;;  %v145_v49 = vld [vmem:[#allocation2 + $0x42] sm:$0xff] }
  0x35   :  { %398 = vrot.lane.b32.xlu0 %v3112_v16, %s3011_s26  ;;  %v130_v50 = vld [vmem:[#allocation2 + $0x51] sm:$0xff]  ;;  %v3263_v54 = vld [vmem:[#allocation2 + $0x60] sm:$0xff] }
  0x36   :  { %v3254_v51 = vld [vmem:[#allocation2 + $0x50] sm:$0xff]  ;;  %v178_v55 = vld [vmem:[#allocation2 + $0x61] sm:$0xff] }
  0x37   :  { %v146_v52 = vld [vmem:[#allocation2 + $0x52] sm:$0xff]  ;;  %v147_v57 = vld [vmem:[#allocation2 + $0x62] sm:$0xff] }
  0x38   :  { %274 = vrot.lane.b32.xlu1 %v127_v17, %s3008_s23  ;;  %v132_v58 = vld [vmem:[#allocation2 + $0x71] sm:$0xff]  ;;  %v164_v62 = vld [vmem:[#allocation2 + $0x80] sm:$0xff] }
  0x39   :  { %462 = vrot.lane.b32.xlu0 %v126_v14, %s3012_s27  ;;  %v3280_v59 = vld [vmem:[#allocation2 + $0x70] sm:$0xff]  ;;  %v180_v63 = vld [vmem:[#allocation2 + $0x81] sm:$0xff] }
  0x3a   :  { %v148_v60 = vld [vmem:[#allocation2 + $0x72] sm:$0xff]  ;;  %v196_v5 = vld [vmem:[#allocation2 + $0x82] sm:$0xff] }
  0x3b   :  { %v134_v4 = vld [vmem:[#allocation2 + $0xb1] sm:$0xff]  ;;  %v151_v56 = vld [vmem:[#allocation2 + $0xc2] sm:$0xff] }
  0x3c   :  { %526 = vrot.lane.b32.xlu1 %v142_v13, %s3013_s28  ;;  %v3303_v8 = vld [vmem:[#allocation2 + $0xb0] sm:$0xff] }
  0x3d   :  { %464 = vrot.lane.b32.xlu0 %v127_v17, %s3012_s27  ;;  %v150_v9 = vld [vmem:[#allocation2 + $0xb2] sm:$0xff] }
  0x40   :  { %338 = vrot.lane.b32.xlu1 %v143_v19, %s3010_s0 }
  0x41   :  { %276 = vrot.lane.b32.xlu0 %v128_v20, %s3008_s23 }
  0x44   :  { %590 = vrot.lane.b32.xlu1 %v3110_v15, %s3014_s6 }
  0x45   :  { %528 = vrot.lane.b32.xlu0 %v143_v19, %s3013_s28 }
  0x48   :  { %402 = vrot.lane.b32.xlu1 %v3156_v28, %s3011_s26 }
  0x49   :  { %340 = vrot.lane.b32.xlu0 %v144_v29, %s3010_s0 }
  0x4c   :  { %654 = vrot.lane.b32.xlu1 %v127_v17, %s3015_s15  ;;  %v3314_v17 = vld [vmem:[#allocation2 + $0xc0] sm:$0xff] }
  0x4d   :  { %592 = vrot.lane.b32.xlu0 %v3156_v28, %s3014_s6 }
  0x50   :  { %466 = vrot.lane.b32.xlu1 %v128_v20, %s3012_s27 }
  0x51   :  { %404 = vrot.lane.b32.xlu0 %v3209_v41, %s3011_s26 }
  0x54   :  { %718 = vrot.lane.b32.xlu1 %v143_v19, %s3016_s24 }
  0x55   :  { %656 = vrot.lane.b32.xlu0 %v128_v20, %s3015_s15  ;;  %v229_v20 = vld [vmem:[#allocation2 + $0x91] sm:$0xff] }
  0x58   :  { %468 = vrot.lane.b32.xlu1 %v176_v47, %s3012_s27 }
  0x59   :  { %278 = vrot.lane.b32.xlu0 %v176_v47, %s3008_s23 }
  0x5c   :  { %720 = vrot.lane.b32.xlu1 %v144_v29, %s3016_s24 }
  0x5d   :  { %530 = vrot.lane.b32.xlu0 %v144_v29, %s3013_s28 }
  0x60   :  { %342 = vrot.lane.b32.xlu1 %v145_v49, %s3010_s0 }
  0x61   :  { %280 = vrot.lane.b32.xlu0 %v130_v50, %s3008_s23 }
  0x64   :  { %594 = vrot.lane.b32.xlu1 %v3209_v41, %s3014_s6 }
  0x65   :  { %532 = vrot.lane.b32.xlu0 %v145_v49, %s3013_s28 }
  0x68   :  { %406 = vrot.lane.b32.xlu1 %v3254_v51, %s3011_s26 }
  0x69   :  { %344 = vrot.lane.b32.xlu0 %v146_v52, %s3010_s0 }
  0x6c   :  { %658 = vrot.lane.b32.xlu1 %v176_v47, %s3015_s15  ;;  %v182_v47 = vld [vmem:[#allocation2 + $0xc1] sm:$0xff] }
  0x6d   :  { %596 = vrot.lane.b32.xlu0 %v3254_v51, %s3014_s6 }
  0x70   :  { %470 = vrot.lane.b32.xlu1 %v130_v50, %s3012_s27 }
  0x71   :  { %408 = vrot.lane.b32.xlu0 %v3263_v54, %s3011_s26 }
  0x74   :  { %722 = vrot.lane.b32.xlu1 %v145_v49, %s3016_s24 }
  0x75   :  { %660 = vrot.lane.b32.xlu0 %v130_v50, %s3015_s15  ;;  %v245_v50 = vld [vmem:[#allocation2 + $0x92] sm:$0xff] }
  0x78   :  { %472 = vrot.lane.b32.xlu1 %v178_v55, %s3012_s27 }
  0x79   :  { %282 = vrot.lane.b32.xlu0 %v178_v55, %s3008_s23 }
  0x7c   :  { %724 = vrot.lane.b32.xlu1 %v146_v52, %s3016_s24 }
  0x7d   :  { %534 = vrot.lane.b32.xlu0 %v146_v52, %s3013_s28 }
  0x80   :  { %346 = vrot.lane.b32.xlu1 %v147_v57, %s3010_s0 }
  0x81   :  { %284 = vrot.lane.b32.xlu0 %v132_v58, %s3008_s23 }
  0x84   :  { %598 = vrot.lane.b32.xlu1 %v3263_v54, %s3014_s6 }
  0x85   :  { %536 = vrot.lane.b32.xlu0 %v147_v57, %s3013_s28 }
  0x88   :  { %410 = vrot.lane.b32.xlu1 %v3280_v59, %s3011_s26 }
  0x89   :  { %348 = vrot.lane.b32.xlu0 %v148_v60, %s3010_s0 }
  0x8c   :  { %662 = vrot.lane.b32.xlu1 %v178_v55, %s3015_s15  ;;  %v109_v55 = vld [vmem:[#allocation2] sm:$0xff] }
  0x8d   :  { %600 = vrot.lane.b32.xlu0 %v3280_v59, %s3014_s6 }
  0x8f   :  { %v335_v1 = vpop.permute.xlu1 %334 }
  0x90   :  { %474 = vrot.lane.b32.xlu1 %v132_v58, %s3012_s27  ;;  %v271_v2 = vpop.permute.xlu0 %270 }
  0x91   :  { %412 = vrot.lane.b32.xlu0 %v164_v62, %s3011_s26 }
  0x94   :  { %726 = vrot.lane.b32.xlu1 %v147_v57, %s3016_s24  ;;  %v136_v57 = vld [vmem:[#allocation2 + $0xd1] sm:$0xff] }
  0x95   :  { %664 = vrot.lane.b32.xlu0 %v132_v58, %s3015_s15  ;;  %v766_v58 = vsel %vm33_vm0, %v109_v55, %v271_v2 }
  0x98   :  { %476 = vrot.lane.b32.xlu1 %v180_v63, %s3012_s27 }
  0x99   :  { %286 = vrot.lane.b32.xlu0 %v133_v0, %s3008_s23 }
  0x9c   :  { %728 = vrot.lane.b32.xlu1 %v148_v60, %s3016_s24 }
  0x9d   :  { %538 = vrot.lane.b32.xlu0 %v148_v60, %s3013_s28 }
  0xa0   :  { %350 = vrot.lane.b32.xlu1 %v149_v3, %s3010_s0 }
  0xa1   :  { %288 = vrot.lane.b32.xlu0 %v134_v4, %s3008_s23 }
  0xa2   :  { %v3299_v6 = vpop.permute.xlu1 %336 }
  0xa3   :  { %v273_v7 = vpop.permute.xlu0 %272 }
  0xa4   :  { %602 = vrot.lane.b32.xlu1 %v164_v62, %s3014_s6  ;;  %v783_v62 = vsel %vm782_vm2, %v766_v58, %v335_v1 }
  0xa5   :  { %540 = vrot.lane.b32.xlu0 %v196_v5, %s3013_s28 }
  0xa6   :  { %v3305_v10 = vpop.permute.xlu1 %400 }
  0xa7   :  { %v399_v11 = vpop.permute.xlu0 %398 }
  0xa8   :  { %414 = vrot.lane.b32.xlu1 %v3303_v8, %s3011_s26 }
  0xa9   :  { %352 = vrot.lane.b32.xlu0 %v150_v9, %s3010_s0 }
  0xaa   :  { %v3310_v13 = vpop.permute.xlu1 %274 }
  0xab   :  { %v463_v14 = vpop.permute.xlu0 %462 }
  0xac   :  { %666 = vrot.lane.b32.xlu1 %v180_v63, %s3015_s15  ;;  %v800_v63 = vsel %vm799_vm3, %v783_v62, %v399_v11  ;;  %v767_v11 = vsel %vm33_vm0, %v3112_v16, %v273_v7 }
  0xad   :  { %604 = vrot.lane.b32.xlu0 %v213_v12, %s3014_s6  ;;  %v817_v2 = vsel %vm816_vm4, %v800_v63, %v463_v14 }
  0xae   :  { %v527_v18 = vpop.permute.xlu1 %526 }
  0xaf   :  { %v465_v19 = vpop.permute.xlu0 %464 }
  0xb0   :  { %478 = vrot.lane.b32.xlu1 %v134_v4, %s3012_s27  ;;  %v834_v4 = vsel %vm833_vm5, %v817_v2, %v527_v18  ;;  %v3378_v2 = vld [vmem:[#allocation2 + $0xe0] sm:$0xff] }
  0xb1   :  { %416 = vrot.lane.b32.xlu0 %v3314_v17, %s3011_s26 }
  0xb2   :  { %v3319_v29 = vpop.permute.xlu1 %338 }
  0xb3   :  { %v3321_v33 = vpop.permute.xlu0 %276 }
  0xb4   :  { %730 = vrot.lane.b32.xlu1 %v196_v5, %s3016_s24  ;;  %v3348_v5 = vld [vmem:[#allocation2 + $0xd0] sm:$0xff] }
  0xb5   :  { %668 = vrot.lane.b32.xlu0 %v229_v20, %s3015_s15 }
  0xb6   :  { %v591_v48 = vpop.permute.xlu1 %590 }
  0xb7   :  { %v529_v49 = vpop.permute.xlu0 %528  ;;  %v851_v1 = vsel %vm850_vm6, %v834_v4, %v591_v48  ;;  %v784_v48 = vsel %vm782_vm2, %v767_v11, %v3299_v6 }
  0xb8   :  { %480 = vrot.lane.b32.xlu1 %v182_v47, %s3012_s27  ;;  %v801_v16 = vsel %vm799_vm3, %v784_v48, %v3305_v10  ;;  %v184_v48 = vld [vmem:[#allocation2 + $0xe1] sm:$0xff] }
  0xb9   :  { %290 = vrot.lane.b32.xlu0 %v182_v47, %s3008_s23 }
  0xba   :  { %v3327_v52 = vpop.permute.xlu1 %402 }
  0xbb   :  { %v3329_v53 = vpop.permute.xlu0 %340 }
  0xbc   :  { %732 = vrot.lane.b32.xlu1 %v245_v50, %s3016_s24 }
  0xbd   :  { %542 = vrot.lane.b32.xlu0 %v150_v9, %s3013_s28  ;;  %v152_v9 = vld [vmem:[#allocation2 + $0xd2] sm:$0xff] }
  0xbe   :  { %v655_v60 = vpop.permute.xlu1 %654 }
  0xbf   :  { %v593_v61 = vpop.permute.xlu0 %592  ;;  %v868_v12 = vsel %vm867_vm7, %v851_v1, %v655_v60  ;;  %v818_v60 = vsel %vm816_vm4, %v801_v16, %v465_v19 }
  0xc0   :  { %354 = vrot.lane.b32.xlu1 %v151_v56, %s3010_s0  ;;  %v835_v63 = vsel %vm833_vm5, %v818_v60, %v529_v49 }
  0xc1   :  { %292 = vrot.lane.b32.xlu0 %v136_v57, %s3008_s23  ;;  %v852_v6 = vsel %vm850_vm6, %v835_v63, %v593_v61 }
  0xc2   :  { %v3338_v0 = vpop.permute.xlu1 %466 }
  0xc3   :  { %v3340_v3 = vpop.permute.xlu0 %404 }
  0xc4   :  { %606 = vrot.lane.b32.xlu1 %v3314_v17, %s3014_s6 }
  0xc5   :  { %544 = vrot.lane.b32.xlu0 %v151_v56, %s3013_s28 }
  0xc6   :  { %v719_v14 = vpop.permute.xlu1 %718 }
  0xc7   :  { %v657_v20 = vpop.permute.xlu0 %656  ;;  %v885_v18 = vsel %vm884_vm8, %v868_v12, %v719_v14 }
  0xc8   :  { %v919_v50 = vsel %vm917_vm9, %v885_v18, 0  ;;  %418 = vrot.lane.b32.xlu1 %v3348_v5, %s3011_s26  ;;  %v869_v4 = vsel %vm867_vm7, %v852_v6, %v657_v20 }
  0xc9   :  { %356 = vrot.lane.b32.xlu0 %v152_v9, %s3010_s0  ;;  %v3360_v55 = vand.u32 4294901760, %v919_v50 }
  0xca   :  { %v3364_v7 = vpop.permute.xlu1 %468 }
  0xcb   :  { %v3366_v58 = vpop.permute.xlu0 %278  ;;  %v3370_v62 = vsub.f32 %v919_v50, %v3360_v55 }
  0xcc   :  { %670 = vrot.lane.b32.xlu1 %v182_v47, %s3015_s15 }
  0xcd   :  { %4082 = vst [vmem:[#allocation12_spill] sm:$0xff] %v3370_v62  ;;  %608 = vrot.lane.b32.xlu0 %v3348_v5, %s3014_s6  ;;  %v1042_v10 = vand.u32 4294901760, %v3370_v62 }
  0xce   :  { %v721_v1 = vpop.permute.xlu1 %720 }
  0xcf   :  { %v531_v19 = vpop.permute.xlu0 %530  ;;  %v886_v11 = vsel %vm884_vm8, %v869_v4, %v721_v1  ;;  %2643 = vmatprep.mubr.f32.mxu0 %v1042_v10  ;;  %v1043_v49 = vsub.f32 %v3370_v62, %v1042_v10 }
  0xd0   :  { %v922_v47 = vsel %vm917_vm9, %v886_v11, 0  ;;  %482 = vrot.lane.b32.xlu1 %v136_v57, %s3012_s27 }
  0xd1   :  { %420 = vrot.lane.b32.xlu0 %v3378_v2, %s3011_s26  ;;  %v3387_v61 = vand.u32 4294901760, %v922_v47  ;;  %v1044_v12 = vand.u32 4294901760, %v1043_v49  ;;  %v768_v49 = vsel %vm33_vm0, %v3110_v15, %v3310_v13  ;;  %v3428_v13 = vld [vmem:[#allocation2 + $0xf0] sm:$0xff] }
  0xd2   :  { %v3389_v14 = vpop.permute.xlu1 %342 }
  0xd3   :  { %v3391_v20 = vpop.permute.xlu0 %280  ;;  %v3394_v18 = vsub.f32 %v922_v47, %v3387_v61  ;;  %2517 = vmatprep.mubr.f32.mxu1 %v1044_v12  ;;  %v785_v47 = vsel %vm782_vm2, %v768_v49, %v3319_v29  ;;  %v154_v29 = vld [vmem:[#allocation2 + $0xf2] sm:$0xff] }
  0xd4   :  { %734 = vrot.lane.b32.xlu1 %v151_v56, %s3016_s24  ;;  %v153_v56 = vld [vmem:[#allocation2 + $0xe2] sm:$0xff]  ;;  %v802_v12 = vsel %vm799_vm3, %v785_v47, %v3327_v52 }
  0xd5   :  { %4083 = vst [vmem:[#allocation13_spill] sm:$0xff] %v3394_v18  ;;  %672 = vrot.lane.b32.xlu0 %v136_v57, %s3015_s15  ;;  %v1052_v50 = vand.u32 4294901760, %v3394_v18  ;;  %v138_v57 = vld [vmem:[#allocation2 + $0xf1] sm:$0xff] }
  0xd6   :  { %v595_v16 = vpop.permute.xlu1 %594 }
  0xd7   :  { %v533_v60 = vpop.permute.xlu0 %532  ;;  %2644 = vmatmul.mubr.f32.vlgmr.msra.gmra.mrb[0].mxu0 %v1052_v50  ;;  %v1053_v63 = vsub.f32 %v3394_v18, %v1052_v50 }
  0xd8   :  { %484 = vrot.lane.b32.xlu1 %v184_v48, %s3012_s27 }
  0xd9   :  { %294 = vrot.lane.b32.xlu0 %v184_v48, %s3008_s23  ;;  %v1054_v6 = vand.u32 4294901760, %v1053_v63  ;;  %v819_v63 = vsel %vm816_vm4, %v802_v12, %v3338_v0  ;;  %v769_v0 = vsel %vm33_vm0, %v3156_v28, %v3321_v33 }
  0xda   :  { %v3402_v10 = vpop.permute.xlu1 %406 }
  0xdb   :  { %v3404_v4 = vpop.permute.xlu0 %344  ;;  %2518 = vmatmul.mubr.f32.vlgmr.msra.gmra.mrb[0].mxu1 %v1054_v6  ;;  %v836_v6 = vsel %vm833_vm5, %v819_v63, %v531_v19 }
  0xdc   :  { %736 = vrot.lane.b32.xlu1 %v152_v9, %s3016_s24  ;;  %v853_v15 = vsel %vm850_vm6, %v836_v6, %v595_v16  ;;  %v786_v16 = vsel %vm782_vm2, %v769_v0, %v3329_v53 }
  0xdd   :  { %546 = vrot.lane.b32.xlu0 %v152_v9, %s3013_s28 }
  0xde   :  { %v659_v1 = vpop.permute.xlu1 %658 }
  0xdf   :  { %v597_v11 = vpop.permute.xlu0 %596  ;;  %v870_v52 = vsel %vm867_vm7, %v853_v15, %v659_v1  ;;  %v803_v1 = vsel %vm799_vm3, %v786_v16, %v3340_v3  ;;  %v3460_v15 = vld [vmem:[#allocation2 + $0x100] sm:$0xff] }
  0xe0   :  { %358 = vrot.lane.b32.xlu1 %v153_v56, %s3010_s0  ;;  %v820_v28 = vsel %vm816_vm4, %v803_v1, %v3364_v7 }
  0xe1   :  { %296 = vrot.lane.b32.xlu0 %v138_v57, %s3008_s23  ;;  %v837_v33 = vsel %vm833_vm5, %v820_v28, %v533_v60 }
  0xe2   :  { %v3417_v50 = vpop.permute.xlu1 %470  ;;  %v854_v53 = vsel %vm850_vm6, %v837_v33, %v597_v11  ;;  %v186_v33 = vld [vmem:[#allocation2 + $0x101] sm:$0xff] }
  0xe3   :  { %v3419_v9 = vpop.permute.xlu0 %408 }
  0xe4   :  { %610 = vrot.lane.b32.xlu1 %v3378_v2, %s3014_s6 }
  0xe5   :  { %548 = vrot.lane.b32.xlu0 %v153_v56, %s3013_s28 }
  0xe6   :  { %v723_v49 = vpop.permute.xlu1 %722 }
  0xe7   :  { %v661_v47 = vpop.permute.xlu0 %660  ;;  %v887_v43 = vsel %vm884_vm8, %v870_v52, %v723_v49 }
  0xe8   :  { %v925_v19 = vsel %vm917_vm9, %v887_v43, 0  ;;  %422 = vrot.lane.b32.xlu1 %v3428_v13, %s3011_s26  ;;  %v871_v52 = vsel %vm867_vm7, %v854_v53, %v661_v47 }
  0xe9   :  { %360 = vrot.lane.b32.xlu0 %v154_v29, %s3010_s0  ;;  %v3441_v12 = vand.u32 4294901760, %v925_v19 }
  0xea   :  { %v3445_v63 = vpop.permute.xlu1 %472 }
  0xeb   :  { %v3447_v6 = vpop.permute.xlu0 %282  ;;  %v3452_v43 = vsub.f32 %v925_v19, %v3441_v12 }
  0xec   :  { %674 = vrot.lane.b32.xlu1 %v184_v48, %s3015_s15 }
  0xed   :  { %4084 = vst [vmem:[#allocation14_spill] sm:$0xff] %v3452_v43  ;;  %612 = vrot.lane.b32.xlu0 %v3428_v13, %s3014_s6  ;;  %v1062_v3 = vand.u32 4294901760, %v3452_v43 }
  0xee   :  { %v725_v49 = vpop.permute.xlu1 %724 }
  0xef   :  { %v535_v7 = vpop.permute.xlu0 %534  ;;  %v888_v0 = vsel %vm884_vm8, %v871_v52, %v725_v49  ;;  %2646 = vmatprep.mubr.f32.mxu0 %v1062_v3  ;;  %v1063_v60 = vsub.f32 %v3452_v43, %v1062_v3 }
  0xf0   :  { %v928_v48 = vsel %vm917_vm9, %v888_v0, 0  ;;  %486 = vrot.lane.b32.xlu1 %v138_v57, %s3012_s27 }
  0xf1   :  { %424 = vrot.lane.b32.xlu0 %v3460_v15, %s3011_s26  ;;  %v3469_v11 = vand.u32 4294901760, %v928_v48  ;;  %v1064_v19 = vand.u32 4294901760, %v1063_v60 }
  0xf2   :  { %v3471_v16 = vpop.permute.xlu1 %346 }
  0xf3   :  { %v3473_v47 = vpop.permute.xlu0 %284  ;;  %v3476_v1 = vsub.f32 %v928_v48, %v3469_v11  ;;  %2520 = vmatprep.mubr.f32.mxu1 %v1064_v19 }
  0xf4   :  { %738 = vrot.lane.b32.xlu1 %v153_v56, %s3016_s24  ;;  %v3490_v56 = vld [vmem:[#allocation2 + $0x102] sm:$0xff] }
  0xf5   :  { %4085 = vst [vmem:[#allocation15_spill] sm:$0xff] %v3476_v1  ;;  %676 = vrot.lane.b32.xlu0 %v138_v57, %s3015_s15  ;;  %v1072_v28 = vand.u32 4294901760, %v3476_v1  ;;  %v3492_v57 = vld [vmem:[#allocation2 + $0x111] sm:$0xff] }
  0xf6   :  { %v599_v53 = vpop.permute.xlu1 %598 }
  0xf7   :  { %v537_v3 = vpop.permute.xlu0 %536  ;;  %2647 = vmatmul.mubr.f32.gmra.mrb[2].mxu0 %v1072_v28  ;;  %v1073_v52 = vsub.f32 %v3476_v1, %v1072_v28  ;;  %v770_v28 = vsel %vm33_vm0, %v3209_v41, %v3366_v58 }
  0xf8   :  { %488 = vrot.lane.b32.xlu1 %v186_v33, %s3012_s27 }
  0xf9   :  { %298 = vrot.lane.b32.xlu0 %v186_v33, %s3008_s23  ;;  %v1074_v49 = vand.u32 4294901760, %v1073_v52  ;;  %v787_v52 = vsel %vm782_vm2, %v770_v28, %v3389_v14  ;;  %v3517_v14 = vld [vmem:[#allocation2 + $0x110] sm:$0xff] }
  0xfa   :  { %v3484_v0 = vpop.permute.xlu1 %410 }
  0xfb   :  { %v3486_v60 = vpop.permute.xlu0 %348  ;;  %2521 = vmatmul.mubr.f32.gmra.mrb[2].mxu1 %v1074_v49 }
  0xfc   :  { %740 = vrot.lane.b32.xlu1 %v154_v29, %s3016_s24 }
  0xfd   :  { %550 = vrot.lane.b32.xlu0 %v154_v29, %s3013_s28  ;;  %v804_v29 = vsel %vm799_vm3, %v787_v52, %v3402_v10  ;;  %v3519_v10 = vld [vmem:[#allocation2 + $0x112] sm:$0xff] }
  0xfe   :  { %v663_v48 = vpop.permute.xlu1 %662  ;;  %v821_v37 = vsel %vm816_vm4, %v804_v29, %v3417_v50 }
  0xff   :  { %v601_v19 = vpop.permute.xlu0 %600  ;;  %v838_v41 = vsel %vm833_vm5, %v821_v37, %v535_v7  ;;  %v771_v37 = vsel %vm33_vm0, %v3254_v51, %v3391_v20 }
 0x100   :  { %362 = vrot.lane.b32.xlu1 %v3490_v56, %s3010_s0  ;;  %v855_v58 = vsel %vm850_vm6, %v838_v41, %v599_v53  ;;  %v788_v53 = vsel %vm782_vm2, %v771_v37, %v3404_v4 }
 0x101   :  { %300 = vrot.lane.b32.xlu0 %v3492_v57, %s3008_s23  ;;  %v872_v28 = vsel %vm867_vm7, %v855_v58, %v663_v48  ;;  %v805_v29 = vsel %vm799_vm3, %v788_v53, %v3419_v9  ;;  %v3558_v9 = vsub.f32 %v3133_v22, %v970_v24 }
 0x102   :  { %v3505_v49 = vpop.permute.xlu1 %474  ;;  %v822_v51 = vsel %vm816_vm4, %v805_v29, %v3445_v63 }
 0x103   :  { %v3507_v42 = vpop.permute.xlu0 %412  ;;  %v839_v4 = vsel %vm833_vm5, %v822_v51, %v537_v3  ;;  %v1210_v37 = vand.u32 4294901760, %v3558_v9 }
 0x104   :  { %614 = vrot.lane.b32.xlu1 %v3460_v15, %s3014_s6  ;;  %v856_v63 = vsel %vm850_vm6, %v839_v4, %v601_v19 }
 0x105   :  { %552 = vrot.lane.b32.xlu0 %v3490_v56, %s3013_s28 }
 0x106   :  { %v727_v52 = vpop.permute.xlu1 %726 }
 0x107   :  { %v665_v36 = vpop.permute.xlu0 %664  ;;  %v889_v50 = vsel %vm884_vm8, %v872_v28, %v727_v52  ;;  %v3549_v28 = vsub.f32 %v3128_v21, %v967_v23 }
 0x108   :  { %v931_v7 = vsel %vm917_vm9, %v889_v50, 0  ;;  %426 = vrot.lane.b32.xlu1 %v3517_v14, %s3011_s26  ;;  %v3562_v50 = vld [vmem:[#allocation2 + $0x120] sm:$0xff]  ;;  %v873_v23 = vsel %vm867_vm7, %v856_v63, %v665_v36  ;;  %v1211_v36 = vsub.f32 %v3558_v9, %v1210_v37 }
 0x109   :  { %364 = vrot.lane.b32.xlu0 %v3519_v10, %s3010_s0  ;;  %v3533_v48 = vand.u32 4294901760, %v931_v7  ;;  %v1203_v21 = vand.u32 4294901760, %v3549_v28 }
 0x10a   :  { %v3537_v41 = vpop.permute.xlu1 %476 }
 0x10b   :  { %v3539_v58 = vpop.permute.xlu0 %286  ;;  %v3544_v20 = vsub.f32 %v931_v7, %v3533_v48  ;;  %v1204_v24 = vsub.f32 %v3549_v28, %v1203_v21  ;;  %v2815_v53 = vpack.c.bf16 %v1210_v37, %v1203_v21  ;;  %v3594_v37 = vsub.f32 %v3149_v26, %v973_v30 }
 0x10c   :  { %678 = vrot.lane.b32.xlu1 %v186_v33, %s3015_s15 }
 0x10d   :  { %4086 = vst [vmem:[#allocation16_spill] sm:$0xff] %v3544_v20  ;;  %616 = vrot.lane.b32.xlu0 %v3517_v14, %s3014_s6  ;;  %v1082_v52 = vand.u32 4294901760, %v3544_v20  ;;  %v1205_v4 = vand.u32 4294901760, %v1204_v24  ;;  %2816 = vmatprep.subr.bf16.mxu0 %v2815_v53  ;;  %v3602_v24 = vld [vmem:[#allocation2 + $0x121] sm:$0xff] }
 0x10e   :  { %v729_v3 = vpop.permute.xlu1 %728  ;;  %2818 = vmatpush3.bf16.msra.mxu0 %v2815_v53 }
 0x10f   :  { %v3566_v33 = vpop.permute.xlu0 %538  ;;  %v890_v7 = vsel %vm884_vm8, %v873_v23, %v729_v3  ;;  %2649 = vmatprep.mubr.f32.mxu0 %v1082_v52  ;;  %v1083_v22 = vsub.f32 %v3544_v20, %v1082_v52  ;;  %v1212_v23 = vand.u32 4294901760, %v1211_v36 }
 0x110   :  { %v934_v19 = vsel %vm917_vm9, %v890_v7, 0  ;;  %490 = vrot.lane.b32.xlu1 %v3492_v57, %s3012_s27  ;;  %v3599_v7 = vsub.f32 %v3154_v27, %v976_v31 }
 0x111   :  { %428 = vrot.lane.b32.xlu0 %v3562_v50, %s3011_s26  ;;  %v3578_v29 = vand.u32 4294901760, %v934_v19  ;;  %v1084_v51 = vand.u32 4294901760, %v1083_v22  ;;  %v2767_v21 = vpack.c.bf16 %v1212_v23, %v1205_v4  ;;  %v4088_v4 = vand.u32 4294901760, %v3176_v34  ;;  %s3018_s26 = smov 96  }
 0x112   :  { %v3580_v63 = vpop.permute.xlu1 %350  ;;  %v1224_v36 = vand.u32 4294901760, %v3599_v7 }
 0x113   :  { %v3582_v52 = vpop.permute.xlu0 %288  ;;  %v3585_v3 = vsub.f32 %v934_v19, %v3578_v29  ;;  %2523 = vmatprep.mubr.f32.mxu1 %v1084_v51  ;;  %2768 = vmatprep.subr.bf16.mxu1 %v2767_v21  ;;  %v3617_v51 = vld [vmem:[#allocation2 + $0x122] sm:$0xff]  ;;  %v3622_v23 = vsub.f32 %v3176_v34, %v4088_v4 }
 0x114   :  { %742 = vrot.lane.b32.xlu1 %v3490_v56, %s3016_s24  ;;  %2770 = vmatpush3.bf16.msra.mxu1 %v2767_v21  ;;  %v1225_v30 = vsub.f32 %v3599_v7, %v1224_v36  ;;  %v4089_v21 = vand.u32 4294901760, %v3181_v35 }
 0x115   :  { %4087 = vst [vmem:[#allocation17_spill] sm:$0xff] %v3585_v3  ;;  %680 = vrot.lane.b32.xlu0 %v3492_v57, %s3015_s15  ;;  %v1092_v22 = vand.u32 4294901760, %v3585_v3  ;;  %v1217_v57 = vand.u32 4294901760, %v3594_v37 }
 0x116   :  { %v3604_v19 = vpop.permute.xlu1 %602  ;;  %v1226_v43 = vand.u32 4294901760, %v1225_v30 }
 0x117   :  { %v3606_v56 = vpop.permute.xlu0 %540  ;;  %2650 = vmatmul.mubr.f32.gmra.mrb[4].mxu0 %v1092_v22  ;;  %v1093_v26 = vsub.f32 %v3585_v3, %v1092_v22  ;;  %v1218_v27 = vsub.f32 %v3594_v37, %v1217_v57  ;;  %v2819_v31 = vpack.c.bf16 %v1224_v36, %v1217_v57  ;;  %v3627_v22 = vsub.f32 %v3181_v35, %v4089_v21 }
 0x118   :  { %554 = vrot.lane.b32.xlu1 %v3519_v10, %s3013_s28  ;;  %v1231_v57 = vand.u32 4294901760, %v3622_v23  ;;  %v4090_v35 = vand.u32 4294901760, %v3202_v39 }
 0x119   :  { %492 = vrot.lane.b32.xlu0 %v3602_v24, %s3012_s27  ;;  %v1094_v53 = vand.u32 4294901760, %v1093_v26  ;;  %v1219_v1 = vand.u32 4294901760, %v1218_v27  ;;  %2820 = vmatprep.subr.bf16.mxu0 %v2819_v31  ;;  %v1238_v36 = vand.u32 4294901760, %v3627_v22  ;;  %v4091_v27 = vand.u32 4294901760, %v3207_v40 }
 0x11a   :  { %v3629_v3 = vpop.permute.xlu1 %414  ;;  %2822 = vmatpush3.bf16.msra.mxu0 %v2819_v31  ;;  %v3642_v26 = vsub.f32 %v3202_v39, %v4090_v35  ;;  %v221_v31 = vld [vmem:[#allocation2 + $0x130] sm:$0xff]  ;;  %v772_v39 = vsel %vm33_vm0, %v3263_v54, %v3447_v6 }
 0x11b   :  { %v3631_v20 = vpop.permute.xlu0 %352  ;;  %2524 = vmatmul.mubr.f32.gmra.mrb[4].mxu1 %v1094_v53  ;;  %v2771_v34 = vpack.c.bf16 %v1226_v43, %v1219_v1  ;;  %v3647_v30 = vsub.f32 %v3207_v40, %v4091_v27  ;;  %v1232_v53 = vsub.f32 %v3622_v23, %v1231_v57  ;;  %v1239_v4 = vsub.f32 %v3627_v22, %v1238_v36 }
 0x11c   :  { %556 = vrot.lane.b32.xlu1 %v3617_v51, %s3013_s28  ;;  %v2823_v21 = vpack.c.bf16 %v1238_v36, %v1231_v57  ;;  %v1245_v43 = vand.u32 4294901760, %v3642_v26  ;;  %v789_v27 = vsel %vm782_vm2, %v772_v39, %v3471_v16  ;;  %s3019_s28 = smov 112  }
 0x11d   :  { %744 = vrot.lane.b32.xlu0 %v3519_v10, %s3016_s24  ;;  %2772 = vmatprep.subr.bf16.mxu1 %v2771_v34  ;;  %v1252_v1 = vand.u32 4294901760, %v3647_v30  ;;  %v1233_v40 = vand.u32 4294901760, %v1232_v53  ;;  %v1240_v10 = vand.u32 4294901760, %v1239_v4  ;;  %v806_v54 = vsel %vm799_vm3, %v789_v27, %v3484_v0 }
 0x11e   :  { %v667_v18 = vpop.permute.xlu1 %666  ;;  %2774 = vmatpush3.bf16.msra.mxu1 %v2771_v34  ;;  %2824 = vmatprep.subr.bf16.mxu0 %v2823_v21  ;;  %v1246_v57 = vsub.f32 %v3642_v26, %v1245_v43  ;;  %v3671_v53 = vsub.f32 %v3232_v45, %v3236_v46  ;;  %v823_v16 = vsel %vm816_vm4, %v806_v54, %v3505_v49  ;;  %v253_v45 = vld [vmem:[#allocation2 + $0x132] sm:$0xff] }
 0x11f   :  { %v605_v62 = vpop.permute.xlu0 %604  ;;  %v1253_v36 = vsub.f32 %v3647_v30, %v1252_v1  ;;  %v2827_v35 = vpack.c.bf16 %v1252_v1, %v1245_v43  ;;  %v2775_v38 = vpack.c.bf16 %v1240_v10, %v1233_v40  ;;  %2826 = vmatpush3.bf16.msra.mxu0 %v2823_v21  ;;  %v840_v4 = vsel %vm833_vm5, %v823_v16, %v3566_v33 }
 0x120   :  { %620 = vrot.lane.b32.xlu1 %v221_v31, %s3014_s6  ;;  %v1247_v31 = vand.u32 4294901760, %v1246_v57  ;;  %v1259_v21 = vand.u32 4294901760, %v3671_v53  ;;  %v857_v43 = vsel %vm850_vm6, %v840_v4, %v3604_v19 }
 0x121   :  { %618 = vrot.lane.b32.xlu0 %v3562_v50, %s3014_s6  ;;  %v1254_v50 = vand.u32 4294901760, %v1253_v36  ;;  %2828 = vmatprep.subr.bf16.mxu0 %v2827_v35  ;;  %v874_v49 = vsel %vm867_vm7, %v857_v43, %v667_v18 }
 0x122   :  { %v3665_v6 = vpop.permute.xlu1 %478  ;;  %2776 = vmatprep.subr.bf16.mxu1 %v2775_v38  ;;  %v1260_v33 = vsub.f32 %v3671_v53, %v1259_v21 }
 0x123   :  { %v3667_v34 = vpop.permute.xlu0 %416  ;;  %v2779_v0 = vpack.c.bf16 %v1254_v50, %v1247_v31  ;;  %2778 = vmatpush3.bf16.msra.mxu1 %v2775_v38  ;;  %2830 = vmatpush3.bf16.msra.mxu0 %v2827_v35 }
 0x124   :  { %684 = vrot.lane.b32.xlu1 %v237_v44, %s3015_s15  ;;  %2683 = vmatprep.subr.mxu0 %v1259_v21  ;;  %v1261_v38 = vand.u32 4294901760, %v1260_v33  ;;  %v117_v33 = vld [vmem:[#allocation2 + $0xa0] sm:$0xff] }
 0x125   :  { %682 = vrot.lane.b32.xlu0 %v3602_v24, %s3015_s15  ;;  %2780 = vmatprep.subr.bf16.mxu1 %v2779_v0  ;;  %v773_v24 = vsel %vm33_vm0, %v3280_v59, %v3473_v47  ;;  %v3703_v47 = vpack.c.bf16 %v3558_v9, %v3549_v28 }
 0x126   :  { %v731_v1 = vpop.permute.xlu1 %730  ;;  %v790_v18 = vsel %vm782_vm2, %v773_v24, %v3486_v60 }
 0x127   :  { %v669_v39 = vpop.permute.xlu0 %668  ;;  %v891_v44 = vsel %vm884_vm8, %v874_v49, %v731_v1  ;;  %2782 = vmatpush3.bf16.msra.mxu1 %v2779_v0  ;;  %2684 = vmatpush3.msra.mxu0 %v1259_v21  ;;  %v807_v10 = vsel %vm799_vm3, %v790_v18, %v3507_v42  ;;  %v3737_v1 = vpack.c.bf16 %v3627_v22, %v3622_v23 }
 0x128   :  { %v937_v40 = vsel %vm917_vm9, %v891_v44, 0  ;;  %748 = vrot.lane.b32.xlu1 %v253_v45, %s3016_s24  ;;  %2557 = vmatprep.subr.mxu1 %v1261_v38  ;;  %v824_v60 = vsel %vm816_vm4, %v807_v10, %v3537_v41  ;;  %v3743_v44 = vpack.c.bf16 %v3647_v30, %v3642_v26 }
 0x129   :  { %746 = vrot.lane.b32.xlu0 %v3617_v51, %s3016_s24  ;;  %v3695_v19 = vand.u32 4294901760, %v937_v40  ;;  %2832 = vmatprep.subr.bf16.mxu0 %v3141_v25  ;;  %v841_v36 = vsel %vm833_vm5, %v824_v60, %v3606_v56 }
 0x12a   :  { %v481_v57 = vpop.permute.xlu1 %480  ;;  %v858_v42 = vsel %vm850_vm6, %v841_v36, %v605_v62  ;;  %v3724_v62 = vpack.c.bf16 %v3599_v7, %v3594_v37 }
 0x12b   :  { %v3699_v59 = vpop.permute.xlu0 %290  ;;  %v3709_v51 = vsub.f32 %v937_v40, %v3695_v19  ;;  %2558 = vmatpush3.msra.mxu1 %v1261_v38  ;;  %v875_v27 = vsel %vm867_vm7, %v858_v42, %v669_v39  ;;  %v774_v38 = vsel %vm33_vm0, %v117_v33, %v3539_v58 }
 0x12c   :  { %2784 = vmatprep.subr.bf16.mxu1 %v3703_v47  ;;  %v791_v18 = vsel %vm782_vm2, %v774_v38, %v3580_v63  ;;  %v775_v63 = vsel %vm33_vm0, %v3303_v8, %v3582_v52 }
 0x12d   :  { %v1102_v35 = vand.u32 4294901760, %v3709_v51  ;;  %v808_v23 = vsel %vm799_vm3, %v791_v18, %v3629_v3 }
 0x12e   :  { %v733_v28 = vpop.permute.xlu1 %732  ;;  %v825_v60 = vsel %vm816_vm4, %v808_v23, %v3665_v6 }
 0x12f   :  { %v543_v9 = vpop.permute.xlu0 %542  ;;  %v892_v54 = vsel %vm884_vm8, %v875_v27, %v733_v28  ;;  %2652 = vmatprep.mubr.f32.mxu0 %v1102_v35  ;;  %v1103_v41 = vsub.f32 %v3709_v51, %v1102_v35  ;;  %v792_v27 = vsel %vm782_vm2, %v775_v63, %v3631_v20 }
 0x130   :  { %v940_v31 = vsel %vm917_vm9, %v892_v54, 0  ;;  %v842_v36 = vsel %vm833_vm5, %v825_v60, %v543_v9  ;;  %v809_v28 = vsel %vm799_vm3, %v792_v27, %v3667_v34 }
 0x131   :  { %v3720_v50 = vand.u32 4294901760, %v940_v31  ;;  %v1104_v56 = vand.u32 4294901760, %v1103_v41  ;;  %v826_v41 = vsel %vm816_vm4, %v809_v28, %v481_v57 }
 0x132   :  { %v3726_v16 = vpop.permute.xlu1 %354 }
 0x133   :  { %v3728_v4 = vpop.permute.xlu0 %292  ;;  %v3731_v0 = vsub.f32 %v940_v31, %v3720_v50  ;;  %2526 = vmatprep.mubr.f32.mxu1 %v1104_v56 }
 0x135   :  { %v1112_v21 = vand.u32 4294901760, %v3731_v0 }
 0x136   :  { %v607_v43 = vpop.permute.xlu1 %606 }
 0x137   :  { %v545_v45 = vpop.permute.xlu0 %544  ;;  %2653 = vmatmul.mubr.f32.gmra.mrb[6].mxu0 %v1112_v21  ;;  %v1113_v49 = vsub.f32 %v3731_v0, %v1112_v21  ;;  %v859_v26 = vsel %vm850_vm6, %v842_v36, %v607_v43 }
 0x138   :  { %v843_v8 = vsel %vm833_vm5, %v826_v41, %v545_v45 }
 0x139   :  { %v1114_v37 = vand.u32 4294901760, %v1113_v49 }
 0x13a   :  { %v419_v7 = vpop.permute.xlu1 %418 }
 0x13b   :  { %v3739_v39 = vpop.permute.xlu0 %356  ;;  %2527 = vmatmul.mubr.f32.gmra.mrb[6].mxu1 %v1114_v37 }
 0x13e   :  { %v671_v24 = vpop.permute.xlu1 %670 }
 0x13f   :  { %v609_v40 = vpop.permute.xlu0 %608  ;;  %v876_v30 = vsel %vm867_vm7, %v859_v26, %v671_v24 }
 0x140   :  { %v860_v52 = vsel %vm850_vm6, %v843_v8, %v609_v40 }
 0x142   :  { %v483_v22 = vpop.permute.xlu1 %482 }
 0x143   :  { %v421_v10 = vpop.permute.xlu0 %420 }
 0x146   :  { %v735_v42 = vpop.permute.xlu1 %734 }
 0x147   :  { %v673_v35 = vpop.permute.xlu0 %672  ;;  %v893_v58 = vsel %vm884_vm8, %v876_v30, %v735_v42 }
 0x148   :  { %v943_v3 = vsel %vm917_vm9, %v893_v58, 0  ;;  %v877_v20 = vsel %vm867_vm7, %v860_v52, %v673_v35  ;;  %v776_v58 = vsel %vm33_vm0, %v3314_v17, %v3699_v59  ;;  %v777_v17 = vsel %vm33_vm0, %v3348_v5, %v3728_v4 }
 0x149   :  { %v3763_v6 = vand.u32 4294901760, %v943_v3  ;;  %v793_v63 = vsel %vm782_vm2, %v776_v58, %v3726_v16  ;;  %v794_v16 = vsel %vm782_vm2, %v777_v17, %v3739_v39 }
 0x14a   :  { %v485_v9 = vpop.permute.xlu1 %484 }
 0x14b   :  { %v3767_v54 = vpop.permute.xlu0 %294  ;;  %v3771_v31 = vsub.f32 %v943_v3, %v3763_v6  ;;  %v810_v3 = vsel %vm799_vm3, %v793_v63, %v419_v7 }
 0x14c   :  { %v827_v41 = vsel %vm816_vm4, %v810_v3, %v483_v22  ;;  %v811_v22 = vsel %vm799_vm3, %v794_v16, %v421_v10 }
 0x14d   :  { %v1122_v56 = vand.u32 4294901760, %v3771_v31 }
 0x14e   :  { %v737_v21 = vpop.permute.xlu1 %736 }
 0x14f   :  { %v547_v43 = vpop.permute.xlu0 %546  ;;  %v894_v34 = vsel %vm884_vm8, %v877_v20, %v737_v21  ;;  %2655 = vmatprep.mubr.f32.mxu0 %v1122_v56  ;;  %v1123_v49 = vsub.f32 %v3771_v31, %v1122_v56 }
 0x150   :  { %v946_v57 = vsel %vm917_vm9, %v894_v34, 0  ;;  %v844_v8 = vsel %vm833_vm5, %v827_v41, %v547_v43 }
 0x151   :  { %v3780_v37 = vand.u32 4294901760, %v946_v57  ;;  %v1124_v33 = vand.u32 4294901760, %v1123_v49 }
 0x152   :  { %v3782_v24 = vpop.permute.xlu1 %358 }
 0x153   :  { %v3784_v45 = vpop.permute.xlu0 %296  ;;  %v3787_v40 = vsub.f32 %v946_v57, %v3780_v37  ;;  %2529 = vmatprep.mubr.f32.mxu1 %v1124_v33  ;;  %v828_v57 = vsel %vm816_vm4, %v811_v22, %v485_v9 }
 0x155   :  { %v1132_v38 = vand.u32 4294901760, %v3787_v40 }
 0x156   :  { %v611_v18 = vpop.permute.xlu1 %610 }
 0x157   :  { %v549_v23 = vpop.permute.xlu0 %548  ;;  %2656 = vmatmul.mubr.f32.gmra.mrb[8].mxu0 %v1132_v38  ;;  %v1133_v60 = vsub.f32 %v3787_v40, %v1132_v38  ;;  %v861_v52 = vsel %vm850_vm6, %v844_v8, %v611_v18 }
 0x158   :  { %v845_v38 = vsel %vm833_vm5, %v828_v57, %v549_v23 }
 0x159   :  { %v1134_v36 = vand.u32 4294901760, %v1133_v60 }
 0x15a   :  { %v423_v26 = vpop.permute.xlu1 %422 }
 0x15b   :  { %v3791_v30 = vpop.permute.xlu0 %360  ;;  %2530 = vmatmul.mubr.f32.gmra.mrb[8].mxu1 %v1134_v36 }
 0x15e   :  { %v675_v42 = vpop.permute.xlu1 %674 }
 0x15f   :  { %v613_v35 = vpop.permute.xlu0 %612  ;;  %v878_v56 = vsel %vm867_vm7, %v861_v52, %v675_v42 }
 0x160   :  { %v862_v5 = vsel %vm850_vm6, %v845_v38, %v613_v35 }
 0x162   :  { %v487_v27 = vpop.permute.xlu1 %486 }
 0x163   :  { %v425_v28 = vpop.permute.xlu0 %424 }
 0x166   :  { %v739_v20 = vpop.permute.xlu1 %738 }
 0x167   :  { %v677_v21 = vpop.permute.xlu0 %676  ;;  %v895_v34 = vsel %vm884_vm8, %v878_v56, %v739_v20 }
 0x168   :  { %v949_v59 = vsel %vm917_vm9, %v895_v34, 0  ;;  %v879_v39 = vsel %vm867_vm7, %v862_v5, %v677_v21 }
 0x169   :  { %v3810_v7 = vand.u32 4294901760, %v949_v59 }
 0x16a   :  { %v489_v43 = vpop.permute.xlu1 %488 }
 0x16b   :  { %v3813_v49 = vpop.permute.xlu0 %298  ;;  %v3817_v33 = vsub.f32 %v949_v59, %v3810_v7  ;;  %v778_v59 = vsel %vm33_vm0, %v3378_v2, %v3767_v54  ;;  %v779_v2 = vsel %vm33_vm0, %v3428_v13, %v3784_v45 }
 0x16c   :  { %v795_v16 = vsel %vm782_vm2, %v778_v59, %v3782_v24  ;;  %v796_v24 = vsel %vm782_vm2, %v779_v2, %v3791_v30 }
 0x16d   :  { %v1142_v4 = vand.u32 4294901760, %v3817_v33  ;;  %v812_v22 = vsel %vm799_vm3, %v795_v16, %v423_v26 }
 0x16e   :  { %v741_v18 = vpop.permute.xlu1 %740  ;;  %v829_v5 = vsel %vm816_vm4, %v812_v22, %v487_v27  ;;  %v813_v27 = vsel %vm799_vm3, %v796_v24, %v425_v28 }
 0x16f   :  { %v551_v60 = vpop.permute.xlu0 %550  ;;  %v896_v10 = vsel %vm884_vm8, %v879_v39, %v741_v18  ;;  %2658 = vmatprep.mubr.f32.mxu0 %v1142_v4  ;;  %v1143_v36 = vsub.f32 %v3817_v33, %v1142_v4 }
 0x170   :  { %v952_v9 = vsel %vm917_vm9, %v896_v10, 0  ;;  %v846_v4 = vsel %vm833_vm5, %v829_v5, %v551_v60 }
 0x171   :  { %v3826_v42 = vand.u32 4294901760, %v952_v9  ;;  %v1144_v58 = vand.u32 4294901760, %v1143_v36 }
 0x172   :  { %v363_v63 = vpop.permute.xlu1 %362 }
 0x173   :  { %v301_v23 = vpop.permute.xlu0 %300  ;;  %v3829_v35 = vsub.f32 %v952_v9, %v3826_v42  ;;  %2532 = vmatprep.mubr.f32.mxu1 %v1144_v58 }
 0x175   :  { %v1152_v3 = vand.u32 4294901760, %v3829_v35 }
 0x176   :  { %v615_v41 = vpop.permute.xlu1 %614 }
 0x177   :  { %v553_v8 = vpop.permute.xlu0 %552  ;;  %2659 = vmatmul.mubr.f32.gmra.mrb[10].mxu0 %v1152_v3  ;;  %v1153_v52 = vsub.f32 %v3829_v35, %v1152_v3  ;;  %v863_v39 = vsel %vm850_vm6, %v846_v4, %v615_v41  ;;  %v830_v3 = vsel %vm816_vm4, %v813_v27, %v489_v43  ;;  %v780_v4 = vsel %vm33_vm0, %v3460_v15, %v3813_v49 }
 0x179   :  { %v1154_v56 = vand.u32 4294901760, %v1153_v52  ;;  %v847_v52 = vsel %vm833_vm5, %v830_v3, %v553_v8 }
 0x17a   :  { %v427_v20 = vpop.permute.xlu1 %426 }
 0x17b   :  { %v365_v21 = vpop.permute.xlu0 %364  ;;  %2533 = vmatmul.mubr.f32.gmra.mrb[10].mxu1 %v1154_v56 }
 0x17e   :  { %v679_v34 = vpop.permute.xlu1 %678 }
 0x17f   :  { %v617_v17 = vpop.permute.xlu0 %616  ;;  %v880_v18 = vsel %vm867_vm7, %v863_v39, %v679_v34  ;;  %v781_v39 = vsel %vm33_vm0, %v3517_v14, %v301_v23 }
 0x180   :  { %v864_v13 = vsel %vm850_vm6, %v847_v52, %v617_v17 }
 0x182   :  { %v491_v57 = vpop.permute.xlu1 %490 }
 0x183   :  { %v429_v38 = vpop.permute.xlu0 %428 }
 0x186   :  { %v743_v10 = vpop.permute.xlu1 %742 }
 0x187   :  { %v681_v36 = vpop.permute.xlu0 %680  ;;  %v897_v9 = vsel %vm884_vm8, %v880_v18, %v743_v10  ;;  %v797_v18 = vsel %vm782_vm2, %v780_v4, %v363_v63  ;;  %v798_v10 = vsel %vm782_vm2, %v781_v39, %v365_v21 }
 0x188   :  { %v955_v54 = vsel %vm917_vm9, %v897_v9, 0  ;;  %v881_v56 = vsel %vm867_vm7, %v864_v13, %v681_v36  ;;  %v814_v9 = vsel %vm799_vm3, %v797_v18, %v427_v20  ;;  %v815_v2 = vsel %vm799_vm3, %v798_v10, %v429_v38 }
 0x189   :  { %v3850_v26 = vand.u32 4294901760, %v955_v54  ;;  %v831_v27 = vsel %vm816_vm4, %v814_v9, %v491_v57 }
 0x18a   :  { %v555_v60 = vpop.permute.xlu1 %554 }
 0x18b   :  { %v493_v58 = vpop.permute.xlu0 %492  ;;  %v3855_v41 = vsub.f32 %v955_v54, %v3850_v26  ;;  %v848_v14 = vsel %vm833_vm5, %v831_v27, %v555_v60 }
 0x18c   :  { %v832_v3 = vsel %vm816_vm4, %v815_v2, %v493_v58 }
 0x18d   :  { %v1162_v45 = vand.u32 4294901760, %v3855_v41 }
 0x18e   :  { %v557_v30 = vpop.permute.xlu1 %556 }
 0x18f   :  { %v745_v34 = vpop.permute.xlu0 %744  ;;  %2661 = vmatprep.mubr.f32.mxu0 %v1162_v45  ;;  %v1163_v28 = vsub.f32 %v3855_v41, %v1162_v45  ;;  %v849_v49 = vsel %vm833_vm5, %v832_v3, %v557_v30 }
 0x190   :  { %v898_v59 = vsel %vm884_vm8, %v881_v56, %v745_v34 }
 0x191   :  { %v958_v43 = vsel %vm917_vm9, %v898_v59, 0  ;;  %v1164_v22 = vand.u32 4294901760, %v1163_v28 }
 0x192   :  { %v3864_v16 = vand.u32 4294901760, %v958_v43  ;;  %v621_v5 = vpop.permute.xlu1 %620 }
 0x193   :  { %v619_v8 = vpop.permute.xlu0 %618  ;;  %2535 = vmatprep.mubr.f32.mxu1 %v1164_v22  ;;  %v866_v63 = vsel %vm850_vm6, %v849_v49, %v621_v5 }
 0x194   :  { %v3867_v17 = vsub.f32 %v958_v43, %v3864_v16  ;;  %v865_v23 = vsel %vm850_vm6, %v848_v14, %v619_v8 }
 0x196   :  { %v1172_v36 = vand.u32 4294901760, %v3867_v17  ;;  %v685_v54 = vpop.permute.xlu1 %684 }
 0x197   :  { %v683_v24 = vpop.permute.xlu0 %682  ;;  %v883_v21 = vsel %vm867_vm7, %v866_v63, %v685_v54 }
 0x198   :  { %2662 = vmatmul.mubr.f32.gmra.mrb[12].mxu0 %v1172_v36  ;;  %v1173_v15 = vsub.f32 %v3867_v17, %v1172_v36  ;;  %v882_v38 = vsel %vm867_vm7, %v865_v23, %v683_v24 }
 0x19a   :  { %v1174_v20 = vand.u32 4294901760, %v1173_v15  ;;  %v749_v52 = vpop.permute.xlu1 %748 }
 0x19b   :  { %v747_v57 = vpop.permute.xlu0 %746  ;;  %v900_v58 = vsel %vm884_vm8, %v883_v21, %v749_v52 }
 0x19c   :  { %v899_v13 = vsel %vm884_vm8, %v882_v38, %v747_v57  ;;  %2536 = vmatmul.mubr.f32.gmra.mrb[12].mxu1 %v1174_v20  ;;  %v964_v60 = vsel %vm917_vm9, %v900_v58, 0 }
 0x19d   :  { %v961_v45 = vsel %vm917_vm9, %v899_v13, 0  ;;  %v3892_v56 = vand.u32 4294901760, %v964_v60 }
 0x19e   :  { %v3894_v30 = vand.u32 4294901760, %v961_v45 }
 0x19f   :  { %v3897_v34 = vsub.f32 %v964_v60, %v3892_v56 }
 0x1a0   :  { %v3900_v59 = vsub.f32 %v961_v45, %v3894_v30 }
 0x1a1   :  { %v1192_v43 = vand.u32 4294901760, %v3897_v34 }
 0x1a2   :  { %v1182_v28 = vand.u32 4294901760, %v3900_v59 }
 0x1a3   :  { %v1193_v5 = vsub.f32 %v3897_v34, %v1192_v43 }
 0x1a4   :  { %2664 = vmatprep.mubr.f32.mxu0 %v1182_v28  ;;  %v1183_v22 = vsub.f32 %v3900_v59, %v1182_v28 }
 0x1a5   :  { %2665 = vmatmul.mubr.f32.gmra.mrb[14].mxu0 %v1192_v43  ;;  %v1194_v4 = vand.u32 4294901760, %v1193_v5 }
 0x1a6   :  { %2685 = vmatprep.mubr.f32.mxu0 %v3360_v55  ;;  %v1184_v8 = vand.u32 4294901760, %v1183_v22 }
 0x1a8   :  { %2538 = vmatprep.mubr.f32.mxu1 %v1184_v8 }
 0x1a9   :  { %2539 = vmatmul.mubr.f32.gmra.mrb[14].mxu1 %v1194_v4  ;;  %2686 = vmatmul.mubr.f32.vlgmr.msra.gmra.mrb[0].mxu0 %v3387_v61 }
 0x1aa   :  { %2559 = vmatprep.mubr.f32.mxu1 %v3360_v55  ;;  %2688 = vmatprep.mubr.f32.mxu0 %v3441_v12 }
 0x1ab   :  { %2834 = vmatpush3.bf16.msra.mxu0 %v3141_v25  ;;  %v4092_v25 = vld [vmem:[#allocation10_spill] sm:$0xff] }
 0x1ac   :  { %2836 = vmatprep.subr.bf16.mxu0 %v3168_v32 }
 0x1ad   :  { %2560 = vmatmul.mubr.f32.vlgmr.msra.gmra.mrb[0].mxu1 %v3387_v61  ;;  %2689 = vmatmul.mubr.f32.gmra.mrb[2].mxu0 %v3469_v11 }
 0x1ae   :  { %2786 = vmatpush3.bf16.msra.mxu1 %v3703_v47  ;;  %2562 = vmatprep.mubr.f32.mxu1 %v3441_v12  ;;  %v4096_v47 = vld [vmem:[#allocation14_spill] sm:$0xff] }
 0x1af   :  { %2691 = vmatprep.mubr.f32.mxu0 %v3533_v48  ;;  %2788 = vmatprep.subr.bf16.mxu1 %v3724_v62 }
 0x1b0   :  { %2838 = vmatpush3.bf16.msra.mxu0 %v3168_v32  ;;  %v4093_v32 = vld [vmem:[#allocation11_spill] sm:$0xff] }
 0x1b1   :  { %2563 = vmatmul.mubr.f32.gmra.mrb[2].mxu1 %v3469_v11  ;;  %2692 = vmatmul.mubr.f32.gmra.mrb[4].mxu0 %v3578_v29 }
 0x1b2   :  { %2565 = vmatprep.mubr.f32.mxu1 %v3533_v48  ;;  %2694 = vmatprep.mubr.f32.mxu0 %v3695_v19 }
 0x1b3   :  { %2790 = vmatpush3.bf16.msra.mxu1 %v3724_v62  ;;  %2840 = vmatprep.subr.bf16.mxu0 %v4092_v25  ;;  %v4097_v62 = vld [vmem:[#allocation15_spill] sm:$0xff] }
 0x1b4   :  { %2792 = vmatprep.subr.bf16.mxu1 %v3737_v1  ;;  %2842 = vmatpush3.bf16.msra.mxu0 %v4092_v25 }
 0x1b5   :  { %2566 = vmatmul.mubr.f32.gmra.mrb[4].mxu1 %v3578_v29  ;;  %2695 = vmatmul.mubr.f32.gmra.mrb[6].mxu0 %v3720_v50 }
 0x1b6   :  { %2568 = vmatprep.mubr.f32.mxu1 %v3695_v19  ;;  %2697 = vmatprep.mubr.f32.mxu0 %v3763_v6 }
 0x1b7   :  { %2794 = vmatpush3.bf16.msra.mxu1 %v3737_v1  ;;  %2844 = vmatprep.subr.bf16.mxu0 %v4093_v32 }
 0x1b8   :  { %2796 = vmatprep.subr.bf16.mxu1 %v3743_v44  ;;  %2846 = vmatpush3.bf16.msra.mxu0 %v4093_v32 }
 0x1b9   :  { %2569 = vmatmul.mubr.f32.gmra.mrb[6].mxu1 %v3720_v50  ;;  %2698 = vmatmul.mubr.f32.gmra.mrb[8].mxu0 %v3780_v37 }
 0x1ba   :  { %2571 = vmatprep.mubr.f32.mxu1 %v3763_v6  ;;  %2700 = vmatprep.mubr.f32.mxu0 %v3810_v7 }
 0x1bb   :  { %2798 = vmatpush3.bf16.msra.mxu1 %v3743_v44  ;;  %2725 = vmatprep.subr.mxu0 %v3236_v46 }
 0x1bc   :  { %2599 = vmatprep.subr.mxu1 %v3671_v53  ;;  %2726 = vmatpush3.msra.mxu0 %v3236_v46  ;;  %v4094_v46 = vld [vmem:[#allocation12_spill] sm:$0xff] }
 0x1bd   :  { %2572 = vmatmul.mubr.f32.gmra.mrb[8].mxu1 %v3780_v37  ;;  %2701 = vmatmul.mubr.f32.gmra.mrb[10].mxu0 %v3826_v42 }
 0x1be   :  { %2574 = vmatprep.mubr.f32.mxu1 %v3810_v7  ;;  %2703 = vmatprep.mubr.f32.mxu0 %v3850_v26 }
 0x1bf   :  { %2600 = vmatpush3.msra.mxu1 %v3671_v53  ;;  %v4095_v53 = vld [vmem:[#allocation13_spill] sm:$0xff] }
 0x1c1   :  { %2575 = vmatmul.mubr.f32.gmra.mrb[10].mxu1 %v3826_v42  ;;  %2704 = vmatmul.mubr.f32.gmra.mrb[12].mxu0 %v3864_v16 }
 0x1c2   :  { %2577 = vmatprep.mubr.f32.mxu1 %v3850_v26  ;;  %2706 = vmatprep.mubr.f32.mxu0 %v3894_v30 }
 0x1c5   :  { %2578 = vmatmul.mubr.f32.gmra.mrb[12].mxu1 %v3864_v16  ;;  %2707 = vmatmul.mubr.f32.gmra.mrb[14].mxu0 %v3892_v56 }
 0x1c6   :  { %2580 = vmatprep.mubr.f32.mxu1 %v3894_v30  ;;  %2727 = vmatprep.mubr.f32.mxu0 %v3360_v55  ;;  %v4098_v55 = vld [vmem:[#allocation16_spill] sm:$0xff] }
 0x1c9   :  { %2581 = vmatmul.mubr.f32.gmra.mrb[14].mxu1 %v3892_v56  ;;  %2728 = vmatmul.mubr.f32.vlgmr.msra.gmra.mrb[0].mxu0 %v3387_v61  ;;  %v4099_v61 = vld [vmem:[#allocation17_spill] sm:$0xff] }
 0x1ca   :  { %2601 = vmatprep.mubr.f32.mxu1 %v4094_v46  ;;  %2730 = vmatprep.mubr.f32.mxu0 %v3441_v12 }
 0x1cd   :  { %2602 = vmatmul.mubr.f32.vlgmr.msra.gmra.mrb[0].mxu1 %v4095_v53  ;;  %2731 = vmatmul.mubr.f32.gmra.mrb[2].mxu0 %v3469_v11 }
 0x1ce   :  { %2604 = vmatprep.mubr.f32.mxu1 %v4096_v47  ;;  %2733 = vmatprep.mubr.f32.mxu0 %v3533_v48  ;;  %v3991_v48 = vld [vmem:[%s4064_s2] ss:$0 sm:$0xff]  ;;  %s3017_s2 = smov 80  }
 0x1d1   :  { %2605 = vmatmul.mubr.f32.gmra.mrb[2].mxu1 %v4097_v62  ;;  %2734 = vmatmul.mubr.f32.gmra.mrb[4].mxu0 %v3578_v29 }
 0x1d2   :  { %2607 = vmatprep.mubr.f32.mxu1 %v4098_v55  ;;  %2736 = vmatprep.mubr.f32.mxu0 %v3695_v19 }
 0x1d5   :  { %2608 = vmatmul.mubr.f32.gmra.mrb[4].mxu1 %v4099_v61  ;;  %2737 = vmatmul.mubr.f32.gmra.mrb[6].mxu0 %v3720_v50 }
 0x1d6   :  { %2610 = vmatprep.mubr.f32.mxu1 %v3709_v51  ;;  %2739 = vmatprep.mubr.f32.mxu0 %v3763_v6 }
 0x1d9   :  { %2611 = vmatmul.mubr.f32.gmra.mrb[6].mxu1 %v3731_v0  ;;  %2740 = vmatmul.mubr.f32.gmra.mrb[8].mxu0 %v3780_v37 }
 0x1da   :  { %2613 = vmatprep.mubr.f32.mxu1 %v3771_v31  ;;  %2742 = vmatprep.mubr.f32.mxu0 %v3810_v7 }
 0x1dd   :  { %2614 = vmatmul.mubr.f32.gmra.mrb[8].mxu1 %v3787_v40  ;;  %2743 = vmatmul.mubr.f32.gmra.mrb[10].mxu0 %v3826_v42 }
 0x1de   :  { %2616 = vmatprep.mubr.f32.mxu1 %v3817_v33  ;;  %2745 = vmatprep.mubr.f32.mxu0 %v3850_v26 }
 0x1e1   :  { %2617 = vmatmul.mubr.f32.gmra.mrb[10].mxu1 %v3829_v35  ;;  %2746 = vmatmul.mubr.f32.gmra.mrb[12].mxu0 %v3864_v16 }
 0x1e2   :  { %2619 = vmatprep.mubr.f32.mxu1 %v3855_v41  ;;  %2748 = vmatprep.mubr.f32.mxu0 %v3894_v30 }
 0x1e5   :  { %2620 = vmatmul.mubr.f32.gmra.mrb[12].mxu1 %v3867_v17  ;;  %2749 = vmatmul.mubr.f32.gmra.mrb[14].mxu0 %v3892_v56 }
 0x1e6   :  { %2622 = vmatprep.mubr.f32.mxu1 %v3900_v59 }
 0x1e9   :  { %2623 = vmatmul.mubr.f32.gmra.mrb[14].mxu1 %v3897_v34 }
 0x29c   :  { %v2729_v12 = vpop.f32.mrb[0].mxu0 }
 0x29d   :  { %v2067_v11 = vpop.f32.mrb[1].mxu0 }
 0x2a0   :  { %v2603_v29 = vpop.f32.mrb[0].mxu1  ;;  %v2732_v19 = vpop.f32.mrb[2].mxu0 }
 0x2a1   :  { %v2847_v51 = vadd.f32 %v2603_v29, %v3991_v48  ;;  %v1492_v50 = vpop.f32.mrb[1].mxu1  ;;  %v2079_v0 = vpop.f32.mrb[3].mxu0 }
 0x2a2   :  { %v2849_v1 = vadd.f32 %v3991_v48, %v1492_v50 }
 0x2a3   :  { %v2848_v44 = vadd.f32 %v2847_v51, %v2729_v12 }
 0x2a4   :  { %v2850_v6 = vadd.f32 %v2849_v1, %v2067_v11  ;;  %v2606_v31 = vpop.f32.mrb[2].mxu1  ;;  %v2735_v37 = vpop.f32.mrb[4].mxu0 }
 0x2a5   :  { %v2162_v40 = vmax.f32 %v2848_v44, 0.0  ;;  %v2851_v7 = vadd.f32 %v2606_v31, %v3991_v48  ;;  %v1506_v33 = vpop.f32.mrb[3].mxu1  ;;  %v2091_v42 = vpop.f32.mrb[5].mxu0 }
 0x2a6   :  { %v2161_v35 = vmax.f32 %v2850_v6, 0.0  ;;  %v2853_v26 = vadd.f32 %v3991_v48, %v1506_v33 }
 0x2a7   :  { %2178 = vst.msk [vmem:[#allocation3 + $0x8] sm:$0xff] %vm782_vm2, %v2162_v40  ;;  %v2852_v41 = vadd.f32 %v2851_v7, %v2732_v19 }
 0x2a8   :  { %2177 = vst.msk [vmem:[#allocation3] sm:$0xff] %vm782_vm2, %v2161_v35  ;;  %v2854_v16 = vadd.f32 %v2853_v26, %v2079_v0  ;;  %v2609_v17 = vpop.f32.mrb[4].mxu1  ;;  %v2738_v39 = vpop.f32.mrb[6].mxu0 }
 0x2a9   :  { %v2164_v18 = vmax.f32 %v2852_v41, 0.0  ;;  %v2855_v10 = vadd.f32 %v2609_v17, %v3991_v48  ;;  %v1520_v36 = vpop.f32.mrb[5].mxu1  ;;  %v2103_v9 = vpop.f32.mrb[7].mxu0 }
 0x2aa   :  { %v2163_v2 = vmax.f32 %v2854_v16, 0.0  ;;  %v2857_v54 = vadd.f32 %v3991_v48, %v1520_v36 }
 0x2ab   :  { %2180 = vst.msk [vmem:[#allocation3 + $0x18] sm:$0xff] %vm782_vm2, %v2164_v18  ;;  %v2856_v24 = vadd.f32 %v2855_v10, %v2735_v37 }
 0x2ac   :  { %2179 = vst.msk [vmem:[#allocation3 + $0x10] sm:$0xff] %vm782_vm2, %v2163_v2  ;;  %v2858_v27 = vadd.f32 %v2857_v54, %v2091_v42  ;;  %v2612_v3 = vpop.f32.mrb[6].mxu1  ;;  %v2741_v15 = vpop.f32.mrb[8].mxu0 }
 0x2ad   :  { %v2166_v14 = vmax.f32 %v2856_v24, 0.0  ;;  %v2859_v49 = vadd.f32 %v2612_v3, %v3991_v48  ;;  %v1534_v63 = vpop.f32.mrb[7].mxu1  ;;  %v2115_v23 = vpop.f32.mrb[9].mxu0 }
 0x2ae   :  { %v2165_v20 = vmax.f32 %v2858_v27, 0.0  ;;  %v2861_v21 = vadd.f32 %v3991_v48, %v1534_v63 }
 0x2af   :  { %2182 = vst.msk [vmem:[#allocation3 + $0x28] sm:$0xff] %vm782_vm2, %v2166_v14  ;;  %v2860_v38 = vadd.f32 %v2859_v49, %v2738_v39 }
 0x2b0   :  { %2181 = vst.msk [vmem:[#allocation3 + $0x20] sm:$0xff] %vm782_vm2, %v2165_v20  ;;  %v2862_v52 = vadd.f32 %v2861_v21, %v2103_v9  ;;  %v2615_v57 = vpop.f32.mrb[8].mxu1  ;;  %v2744_v58 = vpop.f32.mrb[10].mxu0 }
 0x2b1   :  { %v2168_v13 = vmax.f32 %v2860_v38, 0.0  ;;  %v2863_v60 = vadd.f32 %v2615_v57, %v3991_v48  ;;  %v1548_v45 = vpop.f32.mrb[9].mxu1  ;;  %v2127_v56 = vpop.f32.mrb[11].mxu0 }
 0x2b2   :  { %v2167_v30 = vmax.f32 %v2862_v52, 0.0  ;;  %v2865_v34 = vadd.f32 %v3991_v48, %v1548_v45 }
 0x2b3   :  { %2184 = vst.msk [vmem:[#allocation3 + $0x38] sm:$0xff] %vm782_vm2, %v2168_v13  ;;  %v2864_v59 = vadd.f32 %v2863_v60, %v2741_v15  ;;  %v2201_v0 = vld [vmem:[#allocation3 + $0x1] ss:$8 sm:$0xf] }
 0x2b4   :  { %2183 = vst.msk [vmem:[#allocation3 + $0x30] sm:$0xff] %vm782_vm2, %v2167_v30  ;;  %v2866_v28 = vadd.f32 %v2865_v34, %v2115_v23  ;;  %v2618_v43 = vpop.f32.mrb[10].mxu1  ;;  %v2747_v22 = vpop.f32.mrb[12].mxu0  ;;  %v2209_v41 = vld [vmem:[#allocation3 + $0x2] ss:$8 sm:$0xf] }
 0x2b5   :  { %v2170_v5 = vmax.f32 %v2864_v59, 0.0  ;;  %v2867_v8 = vadd.f32 %v2618_v43, %v3991_v48  ;;  %v1562_v4 = vpop.f32.mrb[11].mxu1  ;;  %v2139_v25 = vpop.f32.mrb[13].mxu0  ;;  %v2217_v36 = vld [vmem:[#allocation3 + $0x3] ss:$8 sm:$0xf] }
 0x2b6   :  { %v2169_v32 = vmax.f32 %v2866_v28, 0.0  ;;  %v2869_v46 = vadd.f32 %v3991_v48, %v1562_v4  ;;  %v2225_v2 = vld [vmem:[#allocation3 + $0x4] ss:$8 sm:$0xf] }
 0x2b7   :  { %2186 = vst.msk [vmem:[#allocation3 + $0x48] sm:$0xff] %vm782_vm2, %v2170_v5  ;;  %v2868_v53 = vadd.f32 %v2867_v8, %v2744_v58  ;;  %v2233_v27 = vld [vmem:[#allocation3 + $0x5] ss:$8 sm:$0xf] }
 0x2b8   :  { %2185 = vst.msk [vmem:[#allocation3 + $0x40] sm:$0xff] %vm782_vm2, %v2169_v32  ;;  %v2870_v47 = vadd.f32 %v2869_v46, %v2127_v56  ;;  %v2621_v62 = vpop.f32.mrb[12].mxu1  ;;  %v2750_v55 = vpop.f32.mrb[14].mxu0  ;;  %v2241_v20 = vld [vmem:[#allocation3 + $0x6] ss:$8 sm:$0xf] }
 0x2b9   :  { %v2172_v61 = vmax.f32 %v2868_v53, 0.0  ;;  %v2871_v12 = vadd.f32 %v2621_v62, %v3991_v48  ;;  %v1576_v11 = vpop.f32.mrb[13].mxu1  ;;  %v2151_v29 = vpop.f32.mrb[15].mxu0  ;;  %v2249_v13 = vld [vmem:[#allocation3 + $0x7] ss:$8 sm:$0xf] }
 0x2ba   :  { %v2171_v19 = vmax.f32 %v2870_v47, 0.0  ;;  %v2873_v51 = vadd.f32 %v3991_v48, %v1576_v11 }
 0x2bb   :  { %2188 = vst.msk [vmem:[#allocation3 + $0x58] sm:$0xff] %vm782_vm2, %v2172_v61  ;;  %v2872_v50 = vadd.f32 %v2871_v12, %v2747_v22  ;;  %v2202_v1 = vld [vmem:[#allocation3 + $0x1] ss:$8 sm:$0xf0] }
 0x2bc   :  { %2187 = vst.msk [vmem:[#allocation3 + $0x50] sm:$0xff] %vm782_vm2, %v2171_v19  ;;  %v2874_v44 = vadd.f32 %v2873_v51, %v2139_v25  ;;  %v2624_v6 = vpop.f32.mrb[14].mxu1  ;;  %v2203_v31 = vor.u32 %v2202_v1, %v2201_v0  ;;  %v2210_v33 = vld [vmem:[#allocation3 + $0x2] ss:$8 sm:$0xf0] }
 0x2bd   :  { %v2174_v37 = vmax.f32 %v2872_v50, 0.0  ;;  %v2875_v40 = vadd.f32 %v2624_v6, %v3991_v48  ;;  %v1590_v7 = vpop.f32.mrb[15].mxu1  ;;  %v2211_v17 = vor.u32 %v2210_v33, %v2209_v41  ;;  %v2218_v18 = vld [vmem:[#allocation3 + $0x3] ss:$8 sm:$0xf0] }
 0x2be   :  { %v2173_v42 = vmax.f32 %v2874_v44, 0.0  ;;  %v2877_v35 = vadd.f32 %v3991_v48, %v1590_v7  ;;  %2258 = vrot.lane.b32.xlu0 %v2203_v31, %s3010_s0  ;;  %v2219_v48 = vor.u32 %v2218_v18, %v2217_v36  ;;  %v2226_v9 = vld [vmem:[#allocation3 + $0x4] ss:$8 sm:$0xf0] }
 0x2bf   :  { %2190 = vst.msk [vmem:[#allocation3 + $0x68] sm:$0xff] %vm782_vm2, %v2174_v37  ;;  %v2876_v26 = vadd.f32 %v2875_v40, %v2750_v55  ;;  %v2227_v54 = vor.u32 %v2226_v9, %v2225_v2  ;;  %v2234_v24 = vld [vmem:[#allocation3 + $0x5] ss:$8 sm:$0xf0] }
 0x2c0   :  { %2189 = vst.msk [vmem:[#allocation3 + $0x60] sm:$0xff] %vm782_vm2, %v2173_v42  ;;  %v2878_v16 = vadd.f32 %v2877_v35, %v2151_v29  ;;  %v2235_v14 = vor.u32 %v2234_v24, %v2233_v27  ;;  %v2242_v63 = vld [vmem:[#allocation3 + $0x6] ss:$8 sm:$0xf0] }
 0x2c1   :  { %v2176_v39 = vmax.f32 %v2876_v26, 0.0  ;;  %v2243_v38 = vor.u32 %v2242_v63, %v2241_v20  ;;  %v2250_v57 = vld [vmem:[#allocation3 + $0x7] ss:$8 sm:$0xf0] }
 0x2c2   :  { %v2175_v10 = vmax.f32 %v2878_v16, 0.0  ;;  %2266 = vrot.lane.b32.xlu0 %v2211_v17, %s3012_s27  ;;  %v2251_v45 = vor.u32 %v2250_v57, %v2249_v13  ;;  %v2194_v61 = vld [vmem:[#allocation3] ss:$8 sm:$0xf0] }
 0x2c3   :  { %2192 = vst.msk [vmem:[#allocation3 + $0x78] sm:$0xff] %vm782_vm2, %v2176_v39  ;;  %v2205_v3 = vld [vmem:[#allocation3 + $0x41] ss:$8 sm:$0xf] }
 0x2c4   :  { %2191 = vst.msk [vmem:[#allocation3 + $0x70] sm:$0xff] %vm782_vm2, %v2175_v10  ;;  %v2213_v21 = vld [vmem:[#allocation3 + $0x42] ss:$8 sm:$0xf] }
 0x2c5   :  { %v2221_v60 = vld [vmem:[#allocation3 + $0x43] ss:$8 sm:$0xf]  ;;  %v2229_v34 = vld [vmem:[#allocation3 + $0x44] ss:$8 sm:$0xf] }
 0x2c6   :  { %2274 = vrot.lane.b32.xlu0 %v2219_v48, %s3014_s6  ;;  %v2237_v43 = vld [vmem:[#allocation3 + $0x45] ss:$8 sm:$0xf]  ;;  %v2245_v8 = vld [vmem:[#allocation3 + $0x46] ss:$8 sm:$0xf] }
 0x2c7   :  { %v2253_v32 = vld [vmem:[#allocation3 + $0x47] ss:$8 sm:$0xf]  ;;  %v2193_v12 = vld [vmem:[#allocation3] ss:$8 sm:$0xf] }
 0x2c8   :  { %v2195_v19 = vor.u32 %v2194_v61, %v2193_v12  ;;  %v2197_v26 = vld [vmem:[#allocation3 + $0x40] ss:$8 sm:$0xf] }
 0x2ca   :  { %2282 = vrot.lane.b32.xlu0 %v2227_v54, %s3016_s24 }
 0x2cb   :  { %v2206_v15 = vld [vmem:[#allocation3 + $0x41] ss:$8 sm:$0xf0]  ;;  %v2214_v23 = vld [vmem:[#allocation3 + $0x42] ss:$8 sm:$0xf0] }
 0x2cc   :  { %v2207_v49 = vor.u32 %v2206_v15, %v2205_v3  ;;  %v2215_v52 = vor.u32 %v2214_v23, %v2213_v21  ;;  %v2222_v58 = vld [vmem:[#allocation3 + $0x43] ss:$8 sm:$0xf0]  ;;  %v2230_v30 = vld [vmem:[#allocation3 + $0x44] ss:$8 sm:$0xf0] }
 0x2cd   :  { %v2223_v56 = vor.u32 %v2222_v58, %v2221_v60  ;;  %v2231_v59 = vor.u32 %v2230_v30, %v2229_v34  ;;  %v2238_v28 = vld [vmem:[#allocation3 + $0x45] ss:$8 sm:$0xf0]  ;;  %v2246_v5 = vld [vmem:[#allocation3 + $0x46] ss:$8 sm:$0xf0] }
 0x2ce   :  { %2290 = vrot.lane.b32.xlu0 %v2235_v14, %s3017_s2  ;;  %2260 = vrot.lane.b32.xlu1 %v2207_v49, %s3010_s0  ;;  %v2239_v22 = vor.u32 %v2238_v28, %v2237_v43  ;;  %v2247_v4 = vor.u32 %v2246_v5, %v2245_v8  ;;  %v2254_v25 = vld [vmem:[#allocation3 + $0x47] ss:$8 sm:$0xf0]  ;;  %v2198_v35 = vld [vmem:[#allocation3 + $0x40] ss:$8 sm:$0xf0] }
 0x2cf   :  { %v2255_v46 = vor.u32 %v2254_v25, %v2253_v32  ;;  %v2199_v16 = vor.u32 %v2198_v35, %v2197_v26  ;;  %s3020_s0 = smov [#allocation7]  }
 0x2d2   :  { %2298 = vrot.lane.b32.xlu0 %v2243_v38, %s3018_s26  ;;  %2268 = vrot.lane.b32.xlu1 %v2215_v52, %s3012_s27  ;;  %s2336_s27 = sshll.u32 %s3020_s0, 4  ;;  %s2337_s27 = int_to_ptr.vmem [resolvable:$true] %s2336_s27 }
 0x2d3   :  { %s2980_s29 = scalar_lea.vmem %s2337_s27, 256  ;;  %p2985_p9 = scmp.lt.s32.totalorder %s2337_s27, %s2337_s27 }
 0x2d4   :  { %p2981_p8 = scmp.ne.s32.totalorder %s2337_s27, %s2980_s29  ;;  %p2986_p10 = scmp.lt.s32.totalorder %s2980_s29, %s2980_s29 }
 0x2d6   :  { %2306 = vrot.lane.b32.xlu0 %v2251_v45, %s3019_s28  ;;  %2276 = vrot.lane.b32.xlu1 %v2223_v56, %s3014_s6  ;;  %p2987_p11 = por %p2986_p10, %p2985_p9 }
 0x2d8   :  { %p2988_p12 = pnand %p2987_p11, %p2981_p8 }
 0x2da   :  { %2284 = vrot.lane.b32.xlu1 %v2231_v59, %s3016_s24 }
 0x2de   :  { %2292 = vrot.lane.b32.xlu1 %v2239_v22, %s3017_s2 }
 0x2e2   :  { %2300 = vrot.lane.b32.xlu1 %v2247_v4, %s3018_s26 }
 0x2e6   :  { %2308 = vrot.lane.b32.xlu1 %v2255_v46, %s3019_s28 }
 0x330   :  { %v2259_v53 = vpop.permute.xlu0 %2258 }
 0x331   :  { %v2312_v51 = vsel %vm782_vm2, %v2195_v19, %v2259_v53 }
 0x334   :  { %v2267_v47 = vpop.permute.xlu0 %2266 }
 0x335   :  { %v2314_v50 = vsel %vm816_vm4, %v2312_v51, %v2267_v47 }
 0x338   :  { %v2275_v62 = vpop.permute.xlu0 %2274 }
 0x339   :  { %v2316_v44 = vsel %vm850_vm6, %v2314_v50, %v2275_v62 }
 0x33c   :  { %v2283_v55 = vpop.permute.xlu0 %2282 }
 0x33d   :  { %v2318_v6 = vsel %vm884_vm8, %v2316_v44, %v2283_v55 }
 0x340   :  { %v2291_v11 = vpop.permute.xlu0 %2290  ;;  %v2261_v29 = vpop.permute.xlu1 %2260 }
 0x341   :  { %v2321_v31 = vsel %vm2320_vm10, %v2318_v6, %v2291_v11  ;;  %v2313_v17 = vsel %vm782_vm2, %v2199_v16, %v2261_v29 }
 0x344   :  { %v2299_v0 = vpop.permute.xlu0 %2298  ;;  %v2269_v1 = vpop.permute.xlu1 %2268 }
 0x345   :  { %v2324_v37 = vsel %vm2323_vm11, %v2321_v31, %v2299_v0  ;;  %v2315_v39 = vsel %vm816_vm4, %v2313_v17, %v2269_v1 }
 0x348   :  { %v2307_v40 = vpop.permute.xlu0 %2306  ;;  %v2277_v7 = vpop.permute.xlu1 %2276 }
 0x349   :  { %v2327_v33 = vsel %vm2326_vm12, %v2324_v37, %v2307_v40  ;;  %v2317_v10 = vsel %vm850_vm6, %v2315_v39, %v2277_v7 }
 0x34a   :  { %2329 = vst [vmem:[#allocation7] sm:$0xff] %v2327_v33 }
 0x34c   :  { %v2285_v42 = vpop.permute.xlu1 %2284 }
 0x34d   :  { %v2319_v36 = vsel %vm884_vm8, %v2317_v10, %v2285_v42 }
 0x350   :  { %v2293_v41 = vpop.permute.xlu1 %2292 }
 0x351   :  { %v2322_v48 = vsel %vm2320_vm10, %v2319_v36, %v2293_v41 }
 0x354   :  { %v2301_v18 = vpop.permute.xlu1 %2300 }
 0x355   :  { %v2325_v9 = vsel %vm2323_vm11, %v2322_v48, %v2301_v18 }
 0x358   :  { %v2309_v2 = vpop.permute.xlu1 %2308 }
 0x359   :  { %v2328_v54 = vsel %vm2326_vm12, %v2325_v9, %v2309_v2 }
 0x35a   :  { %2330 = vst [vmem:[#allocation7 + $0x8] sm:$0xff] %v2328_v54 }
 0x35b   :  { %2991 = shalt.err (!%p2988_p12)
}
 0x35c   :  { %s2992_s5 = scalar_lea.hbm %s4065_s3, 256 }
 0x35d   :  { %p2993_p13 = scmp.ne.s32.totalorder %s4065_s3, %s2992_s5  ;;  %p2996_p0 = scmp.lt.u32.totalorder %s2992_s5, %s4065_s3 }
 0x35f   :  { %p2998_p1 = pnand %p2996_p0, %p2993_p13 }
 0x361   :  { %3001 = shalt.err (!%p2998_p1)
}
 0x362   :  { %2342 = dma.vmem_to_hbm [thread:$0]  %s2337_s27, 256, %s4065_s3, [#allocation6], %s3007_s22, %s3007_s22, %s3008_s23  }
 0x363   :  { %3004 = dma.done.wait [#allocation6], 256  }
 0x364   :  { %3005 = vsyncadd [#allocation6], 4294967040 }
 0x365   :  { %2346 = vsyncpa [#allocation5], 1 }
 0x366   :  { %2347 = vsyncpa [#allocation6], 1 }

</bundles_post_ra>
